<compile_context>
chip_gen: v6e
topology: v6e:2x2x1
jax: 0.10.0
libtpu: 0.0.40
codegen_flags: <defaults>
</compile_context>

<pallas_src>
import functools

import jax
import jax.numpy as jnp
from jax.experimental import pallas as pl
from jax.experimental.pallas import tpu as pltpu  # noqa: F401  (TPU backend)


# ----------------------------- Pallas kernels ------------------------------ #

def _conv_mm_kernel(w_ref, p_ref, b_ref, o_ref, *, apply_relu):
    # Lane-dense output: (Cout, M), pixel axis M on lanes.
    y = jnp.dot(w_ref[...], p_ref[...], preferred_element_type=jnp.float32)
    y = y + b_ref[...]
    if apply_relu:
        y = jnp.maximum(y, 0.0)
    o_ref[...] = y.astype(o_ref.dtype)


def conv_matmul(w2, patches, bias, *, apply_relu=True):
    """(Cout,K) @ (K,M) + bias[:,None], optional ReLU. One full-array block."""
    Cout, K = w2.shape
    K2, M = patches.shape
    assert K == K2
    return pl.pallas_call(
        functools.partial(_conv_mm_kernel, apply_relu=apply_relu),
        out_shape=jax.ShapeDtypeStruct((Cout, M), jnp.float32),
        in_specs=[
            pl.BlockSpec((Cout, K), lambda: (0, 0)),
            pl.BlockSpec((K, M), lambda: (0, 0)),
            pl.BlockSpec((Cout, 1), lambda: (0, 0)),
        ],
        out_specs=pl.BlockSpec((Cout, M), lambda: (0, 0)),
    )(w2, patches, bias.reshape(Cout, 1))


def _conv_pool_fc_kernel(w_ref, p_ref, b_ref, pool_ref, fcw_ref, fcb_ref, o_ref):
    # Last conv + ReLU + global average pool (as matmul) + fc, all fused.
    y = jnp.dot(w_ref[...], p_ref[...], preferred_element_type=jnp.float32)
    y = jnp.maximum(y + b_ref[...], 0.0)                                  # (Cout, M)
    pooled = jnp.dot(y, pool_ref[...], preferred_element_type=jnp.float32)  # (Cout, N)
    out = jnp.dot(fcw_ref[...], pooled, preferred_element_type=jnp.float32)
    o_ref[...] = (out + fcb_ref[...]).astype(o_ref.dtype)                 # (O, N)


def conv_pool_fc(w2, patches, bias, pool_mat, fc_w, fc_b):
    Cout, K = w2.shape
    _, M = patches.shape
    _, N = pool_mat.shape
    O = fc_w.shape[0]
    out = pl.pallas_call(
        _conv_pool_fc_kernel,
        out_shape=jax.ShapeDtypeStruct((O, N), jnp.float32),
        in_specs=[
            pl.BlockSpec((Cout, K), lambda: (0, 0)),
            pl.BlockSpec((K, M), lambda: (0, 0)),
            pl.BlockSpec((Cout, 1), lambda: (0, 0)),
            pl.BlockSpec((M, N), lambda: (0, 0)),
            pl.BlockSpec((O, Cout), lambda: (0, 0)),
            pl.BlockSpec((O, 1), lambda: (0, 0)),
        ],
        out_specs=pl.BlockSpec((O, N), lambda: (0, 0)),
    )(w2, patches, bias.reshape(Cout, 1), pool_mat, fc_w, fc_b.reshape(O, 1))
    return out.T  # (N, O)


# ------------------- im2col glue (XLA, transpose-free) --------------------- #

def _im2col_cm(x_cm, k, stride, pad):
    """x_cm: (C, N, D, H, W) channels-major -> patches (C*k^3, N*Do*Ho*Wo).

    Row ordering matches the PyTorch weight flatten of (Cin, kd, kh, kw); the
    channels-major activation layout means NO transposes are needed here, and
    the Pallas (Cout, M) output reshapes directly into the next layer's input.
    """
    C, N, D, H, W = x_cm.shape
    xp = jnp.pad(x_cm, ((0, 0), (0, 0), (pad, pad), (pad, pad), (pad, pad)))
    Do = (D + 2 * pad - k) // stride + 1
    Ho = (H + 2 * pad - k) // stride + 1
    Wo = (W + 2 * pad - k) // stride + 1
    taps = []
    for kd in range(k):
        for kh in range(k):
            for kw in range(k):
                taps.append(
                    xp[:, :,
                       kd:kd + stride * Do:stride,
                       kh:kh + stride * Ho:stride,
                       kw:kw + stride * Wo:stride])
    p = jnp.stack(taps, axis=1)                          # (C, k^3, N, Do, Ho, Wo)
    return p.reshape(C * k ** 3, N * Do * Ho * Wo), (Do, Ho, Wo)


def conv3d_bias_relu_cm(x_cm, w, b, *, stride, pad):
    # w: (Cout, Cin, k, k, k) (PyTorch layout), bias: (Cout,)
    Cout, Cin, k = w.shape[0], w.shape[1], w.shape[2]
    N = x_cm.shape[1]
    patches, (Do, Ho, Wo) = _im2col_cm(x_cm, k, stride, pad)
    w2 = w.reshape(Cout, Cin * k ** 3)                   # (Cout, K)
    out = conv_matmul(w2, patches, b, apply_relu=True)   # (Cout, M) lane-dense
    return out.reshape(Cout, N, Do, Ho, Wo)              # channels-major, no transpose


# --------------------------- model params / forward ------------------------ #

def init_params(key, channels, numoutputs, layers, inplanes=2):
    def kaiming(k_, shape):
        fan_out = shape[0] * shape[2] * shape[3] * shape[4]   # mode='fan_out'
        std = (2.0 / fan_out) ** 0.5
        return std * jax.random.normal(k_, shape, jnp.float32)

    keys = iter(jax.random.split(key, 128))
    params = {
        "conv1_w": kaiming(next(keys), (channels, inplanes, 7, 7, 7)),
        "conv1_b": 0.01 * jax.random.normal(next(keys), (channels,), jnp.float32),
    }
    blocks = []
    for _li, nb in enumerate(layers):
        layer_blocks = []
        for _bi in range(nb):
            w = kaiming(next(keys), (channels, channels, 3, 3, 3))
            bb = 0.01 * jax.random.normal(next(keys), (channels,), jnp.float32)
            layer_blocks.append((w, bb))
        blocks.append(layer_blocks)
    params["blocks"] = blocks
    limit = 1.0 / (channels ** 0.5)
    # PyTorch nn.Linear layout: (out_features, in_features)
    params["fc_w"] = jax.random.uniform(next(keys), (numoutputs, channels),
                                        jnp.float32, -limit, limit)
    params["fc_b"] = jax.random.uniform(next(keys), (numoutputs,),
                                        jnp.float32, -limit, limit)
    return params


def forward(params, x):
    # TODO(synk): the `block` class is not defined in the reference source; it is
    # assumed to be Conv3d(C, C, k=3, stride=2 if downsample else 1, padding=1,
    # bias=True) + ReLU (noBN), with downsample=False for layer1 only.
    # Flatten the conv schedule (static): conv1 + one conv per block.
    convs = [(params["conv1_w"], params["conv1_b"], 2, 2)]   # (w, b, stride, pad)
    for li, layer_blocks in enumerate(params["blocks"]):
        for bi, (w, b) in enumerate(layer_blocks):
            stride = 2 if (bi == 0 and li != 0) else 1
            convs.append((w, b, stride, 1))

    # NCDHW -> channels-major (C, N, D, H, W), done once.
    x_cm = jnp.transpose(x, (1, 0, 2, 3, 4))

    for (w, b, stride, pad) in convs[:-1]:
        x_cm = conv3d_bias_relu_cm(x_cm, w, b, stride=stride, pad=pad)

    # Last conv fused with AdaptiveAvgPool3d((1,1,1)) + flatten + fc.
    w, b, stride, pad = convs[-1]
    Cout, Cin, k = w.shape[0], w.shape[1], w.shape[2]
    N = x_cm.shape[1]
    patches, (Do, Ho, Wo) = _im2col_cm(x_cm, k, stride, pad)
    S = Do * Ho * Wo
    # Averaging matrix (M, N): column n averages that sample's S spatial positions.
    pool = jnp.repeat(jnp.eye(N, dtype=jnp.float32), S, axis=0) / jnp.float32(S)
    return conv_pool_fc(w.reshape(Cout, Cin * k ** 3), patches, b,
                        pool, params["fc_w"], params["fc_b"])


if __name__ == "__main__":
    key = jax.random.PRNGKey(0)
    k_param, k_x = jax.random.split(key)

    channels, numoutputs, layers = 8, 3, [1, 1, 1, 1]
    params = init_params(k_param, channels, numoutputs, layers, inplanes=2)

    # input: (batch=2, inplanes=2, D=16, H=16, W=16), NCDHW like PyTorch
    x = jax.random.normal(k_x, (2, 2, 16, 16, 16), jnp.float32)

    fwd = jax.jit(forward)
    out = fwd(params, x)
    jax.block_until_ready(out)
    assert out.shape == (2, numoutputs)
    print("KERNEL_OK")
</pallas_src>

<mosaic_0001>
module attributes {stable_mosaic.version = 11 : i64} {
  func.func @_conv_mm_kernel(%arg0: memref<8x686xf32, #tpu.memory_space<vmem>>, %arg1: memref<686x686xf32, #tpu.memory_space<vmem>>, %arg2: memref<8x1xf32, #tpu.memory_space<vmem>>, %arg3: memref<8x686xf32, #tpu.memory_space<vmem>>) attributes {dimension_semantics = [], scalar_prefetch = 0 : i64, scratch_operands = 0 : i64, tpu.core_type = #tpu.core_type<tc>} {
    %c0 = arith.constant 0 : index
    %c0_0 = arith.constant 0 : index
    %0 = vector.load %arg0[%c0, %c0_0] : memref<8x686xf32, #tpu.memory_space<vmem>>, vector<8x686xf32>
    %c0_1 = arith.constant 0 : index
    %c0_2 = arith.constant 0 : index
    %1 = vector.load %arg1[%c0_1, %c0_2] : memref<686x686xf32, #tpu.memory_space<vmem>>, vector<686x686xf32>
    %cst = arith.constant dense<0.000000e+00> : vector<8x686xf32>
    %2 = tpu.matmul %0, %1, %cst {dimension_numbers = #tpu.dot_dimension_numbers<[1], [0], [0], [1], [0, 0, 1, 1], [], []>} : vector<8x686xf32>, vector<686x686xf32>, vector<8x686xf32> -> vector<8x686xf32>
    %c0_3 = arith.constant 0 : index
    %c0_4 = arith.constant 0 : index
    %3 = vector.load %arg2[%c0_3, %c0_4] : memref<8x1xf32, #tpu.memory_space<vmem>>, vector<8x1xf32>
    %4 = vector.broadcast %3 : vector<8x1xf32> to vector<8x686xf32>
    %5 = arith.addf %2, %4 : vector<8x686xf32>
    %cst_5 = arith.constant 0.000000e+00 : f32
    %6 = vector.broadcast %cst_5 : f32 to vector<8x686xf32>
    %7 = arith.maximumf %5, %6 : vector<8x686xf32>
    %c0_6 = arith.constant 0 : index
    %c0_7 = arith.constant 0 : index
    %8 = vector.load %arg3[%c0_6, %c0_7] : memref<8x686xf32, #tpu.memory_space<vmem>>, vector<8x686xf32>
    tpu.vector_store %arg3[%c0_6, %c0_7], %7 {strides = array<i32>} : memref<8x686xf32, #tpu.memory_space<vmem>>, vector<8x686xf32>,
    return
  }
}

module attributes {stable_mosaic.version = 11 : i64} {
  func.func @_conv_mm_kernel(%arg0: memref<8x216xf32, #tpu.memory_space<vmem>>, %arg1: memref<216x686xf32, #tpu.memory_space<vmem>>, %arg2: memref<8x1xf32, #tpu.memory_space<vmem>>, %arg3: memref<8x686xf32, #tpu.memory_space<vmem>>) attributes {dimension_semantics = [], scalar_prefetch = 0 : i64, scratch_operands = 0 : i64, tpu.core_type = #tpu.core_type<tc>} {
    %c0 = arith.constant 0 : index
    %c0_0 = arith.constant 0 : index
    %0 = vector.load %arg0[%c0, %c0_0] : memref<8x216xf32, #tpu.memory_space<vmem>>, vector<8x216xf32>
    %c0_1 = arith.constant 0 : index
    %c0_2 = arith.constant 0 : index
    %1 = vector.load %arg1[%c0_1, %c0_2] : memref<216x686xf32, #tpu.memory_space<vmem>>, vector<216x686xf32>
    %cst = arith.constant dense<0.000000e+00> : vector<8x686xf32>
    %2 = tpu.matmul %0, %1, %cst {dimension_numbers = #tpu.dot_dimension_numbers<[1], [0], [0], [1], [0, 0, 1, 1], [], []>} : vector<8x216xf32>, vector<216x686xf32>, vector<8x686xf32> -> vector<8x686xf32>
    %c0_3 = arith.constant 0 : index
    %c0_4 = arith.constant 0 : index
    %3 = vector.load %arg2[%c0_3, %c0_4] : memref<8x1xf32, #tpu.memory_space<vmem>>, vector<8x1xf32>
    %4 = vector.broadcast %3 : vector<8x1xf32> to vector<8x686xf32>
    %5 = arith.addf %2, %4 : vector<8x686xf32>
    %cst_5 = arith.constant 0.000000e+00 : f32
    %6 = vector.broadcast %cst_5 : f32 to vector<8x686xf32>
    %7 = arith.maximumf %5, %6 : vector<8x686xf32>
    %c0_6 = arith.constant 0 : index
    %c0_7 = arith.constant 0 : index
    %8 = vector.load %arg3[%c0_6, %c0_7] : memref<8x686xf32, #tpu.memory_space<vmem>>, vector<8x686xf32>
    tpu.vector_store %arg3[%c0_6, %c0_7], %7 {strides = array<i32>} : memref<8x686xf32, #tpu.memory_space<vmem>>, vector<8x686xf32>,
    return
  }
}

module attributes {stable_mosaic.version = 11 : i64} {
  func.func @_conv_mm_kernel(%arg0: memref<8x216xf32, #tpu.memory_space<vmem>>, %arg1: memref<216x128xf32, #tpu.memory_space<vmem>>, %arg2: memref<8x1xf32, #tpu.memory_space<vmem>>, %arg3: memref<8x128xf32, #tpu.memory_space<vmem>>) attributes {dimension_semantics = [], scalar_prefetch = 0 : i64, scratch_operands = 0 : i64, tpu.core_type = #tpu.core_type<tc>} {
    %c0 = arith.constant 0 : index
    %c0_0 = arith.constant 0 : index
    %0 = vector.load %arg0[%c0, %c0_0] : memref<8x216xf32, #tpu.memory_space<vmem>>, vector<8x216xf32>
    %c0_1 = arith.constant 0 : index
    %c0_2 = arith.constant 0 : index
    %1 = vector.load %arg1[%c0_1, %c0_2] : memref<216x128xf32, #tpu.memory_space<vmem>>, vector<216x128xf32>
    %cst = arith.constant dense<0.000000e+00> : vector<8x128xf32>
    %2 = tpu.matmul %0, %1, %cst {dimension_numbers = #tpu.dot_dimension_numbers<[1], [0], [0], [1], [0, 0, 1, 1], [], []>} : vector<8x216xf32>, vector<216x128xf32>, vector<8x128xf32> -> vector<8x128xf32>
    %c0_3 = arith.constant 0 : index
    %c0_4 = arith.constant 0 : index
    %3 = vector.load %arg2[%c0_3, %c0_4] : memref<8x1xf32, #tpu.memory_space<vmem>>, vector<8x1xf32>
    %4 = vector.broadcast %3 : vector<8x1xf32> to vector<8x128xf32>
    %5 = arith.addf %2, %4 : vector<8x128xf32>
    %cst_5 = arith.constant 0.000000e+00 : f32
    %6 = vector.broadcast %cst_5 : f32 to vector<8x128xf32>
    %7 = arith.maximumf %5, %6 : vector<8x128xf32>
    %c0_6 = arith.constant 0 : index
    %c0_7 = arith.constant 0 : index
    %8 = vector.load %arg3[%c0_6, %c0_7] : memref<8x128xf32, #tpu.memory_space<vmem>>, vector<8x128xf32>
    tpu.vector_store %arg3[%c0_6, %c0_7], %7 {strides = array<i32>} : memref<8x128xf32, #tpu.memory_space<vmem>>, vector<8x128xf32>,
    return
  }
}

module attributes {stable_mosaic.version = 11 : i64} {
  func.func @_conv_mm_kernel(%arg0: memref<8x216xf32, #tpu.memory_space<vmem>>, %arg1: memref<216x16xf32, #tpu.memory_space<vmem>>, %arg2: memref<8x1xf32, #tpu.memory_space<vmem>>, %arg3: memref<8x16xf32, #tpu.memory_space<vmem>>) attributes {dimension_semantics = [], scalar_prefetch = 0 : i64, scratch_operands = 0 : i64, tpu.core_type = #tpu.core_type<tc>} {
    %c0 = arith.constant 0 : index
    %c0_0 = arith.constant 0 : index
    %0 = vector.load %arg0[%c0, %c0_0] : memref<8x216xf32, #tpu.memory_space<vmem>>, vector<8x216xf32>
    %c0_1 = arith.constant 0 : index
    %c0_2 = arith.constant 0 : index
    %1 = vector.load %arg1[%c0_1, %c0_2] : memref<216x16xf32, #tpu.memory_space<vmem>>, vector<216x16xf32>
    %cst = arith.constant dense<0.000000e+00> : vector<8x16xf32>
    %2 = tpu.matmul %0, %1, %cst {dimension_numbers = #tpu.dot_dimension_numbers<[1], [0], [0], [1], [0, 0, 1, 1], [], []>} : vector<8x216xf32>, vector<216x16xf32>, vector<8x16xf32> -> vector<8x16xf32>
    %c0_3 = arith.constant 0 : index
    %c0_4 = arith.constant 0 : index
    %3 = vector.load %arg2[%c0_3, %c0_4] : memref<8x1xf32, #tpu.memory_space<vmem>>, vector<8x1xf32>
    %4 = vector.broadcast %3 : vector<8x1xf32> to vector<8x16xf32>
    %5 = arith.addf %2, %4 : vector<8x16xf32>
    %cst_5 = arith.constant 0.000000e+00 : f32
    %6 = vector.broadcast %cst_5 : f32 to vector<8x16xf32>
    %7 = arith.maximumf %5, %6 : vector<8x16xf32>
    %c0_6 = arith.constant 0 : index
    %c0_7 = arith.constant 0 : index
    %8 = vector.load %arg3[%c0_6, %c0_7] : memref<8x16xf32, #tpu.memory_space<vmem>>, vector<8x16xf32>
    tpu.vector_store %arg3[%c0_6, %c0_7], %7 {strides = array<i32>} : memref<8x16xf32, #tpu.memory_space<vmem>>, vector<8x16xf32>,
    return
  }
}

module attributes {stable_mosaic.version = 11 : i64} {
  func.func @_conv_pool_fc_kernel(%arg0: memref<8x216xf32, #tpu.memory_space<vmem>>, %arg1: memref<216x2xf32, #tpu.memory_space<vmem>>, %arg2: memref<8x1xf32, #tpu.memory_space<vmem>>, %arg3: memref<2x2xf32, #tpu.memory_space<vmem>>, %arg4: memref<3x8xf32, #tpu.memory_space<vmem>>, %arg5: memref<3x1xf32, #tpu.memory_space<vmem>>, %arg6: memref<3x2xf32, #tpu.memory_space<vmem>>) attributes {dimension_semantics = [], scalar_prefetch = 0 : i64, scratch_operands = 0 : i64, tpu.core_type = #tpu.core_type<tc>} {
    %c0 = arith.constant 0 : index
    %c0_0 = arith.constant 0 : index
    %0 = vector.load %arg0[%c0, %c0_0] : memref<8x216xf32, #tpu.memory_space<vmem>>, vector<8x216xf32>
    %c0_1 = arith.constant 0 : index
    %c0_2 = arith.constant 0 : index
    %1 = vector.load %arg1[%c0_1, %c0_2] : memref<216x2xf32, #tpu.memory_space<vmem>>, vector<216x2xf32>
    %cst = arith.constant dense<0.000000e+00> : vector<8x2xf32>
    %2 = tpu.matmul %0, %1, %cst {dimension_numbers = #tpu.dot_dimension_numbers<[1], [0], [0], [1], [0, 0, 1, 1], [], []>} : vector<8x216xf32>, vector<216x2xf32>, vector<8x2xf32> -> vector<8x2xf32>
    %c0_3 = arith.constant 0 : index
    %c0_4 = arith.constant 0 : index
    %3 = vector.load %arg2[%c0_3, %c0_4] : memref<8x1xf32, #tpu.memory_space<vmem>>, vector<8x1xf32>
    %4 = vector.broadcast %3 : vector<8x1xf32> to vector<8x2xf32>
    %5 = arith.addf %2, %4 : vector<8x2xf32>
    %cst_5 = arith.constant 0.000000e+00 : f32
    %6 = vector.broadcast %cst_5 : f32 to vector<8x2xf32>
    %7 = arith.maximumf %5, %6 : vector<8x2xf32>
    %c0_6 = arith.constant 0 : index
    %c0_7 = arith.constant 0 : index
    %8 = vector.load %arg3[%c0_6, %c0_7] : memref<2x2xf32, #tpu.memory_space<vmem>>, vector<2x2xf32>
    %cst_8 = arith.constant dense<0.000000e+00> : vector<8x2xf32>
    %9 = tpu.matmul %7, %8, %cst_8 {dimension_numbers = #tpu.dot_dimension_numbers<[1], [0], [0], [1], [0, 0, 1, 1], [], []>} : vector<8x2xf32>, vector<2x2xf32>, vector<8x2xf32> -> vector<8x2xf32>
    %c0_9 = arith.constant 0 : index
    %c0_10 = arith.constant 0 : index
    %10 = vector.load %arg4[%c0_9, %c0_10] : memref<3x8xf32, #tpu.memory_space<vmem>>, vector<3x8xf32>
    %cst_11 = arith.constant dense<0.000000e+00> : vector<3x2xf32>
    %11 = tpu.matmul %10, %9, %cst_11 {dimension_numbers = #tpu.dot_dimension_numbers<[1], [0], [0], [1], [0, 0, 1, 1], [], []>} : vector<3x8xf32>, vector<8x2xf32>, vector<3x2xf32> -> vector<3x2xf32>
    %c0_12 = arith.constant 0 : index
    %c0_13 = arith.constant 0 : index
    %12 = vector.load %arg5[%c0_12, %c0_13] : memref<3x1xf32, #tpu.memory_space<vmem>>, vector<3x1xf32>
    %13 = vector.broadcast %12 : vector<3x1xf32> to vector<3x2xf32>
    %14 = arith.addf %11, %13 : vector<3x2xf32>
    %c0_14 = arith.constant 0 : index
    %c0_15 = arith.constant 0 : index
    %15 = vector.load %arg6[%c0_14, %c0_15] : memref<3x2xf32, #tpu.memory_space<vmem>>, vector<3x2xf32>
    tpu.vector_store %arg6[%c0_14, %c0_15], %14 {strides = array<i32>} : memref<3x2xf32, #tpu.memory_space<vmem>>, vector<3x2xf32>,
    return
  }
}

</mosaic_0001>

<bundles_post_ra>
// kernel: forward.5
= control target key start
LH: loop header
LB: loop body
LE: loop exit
PB: predicated region body
PF: predicated region fallthrough
CT: control target
= control target key end

     0   :  { %vm546_vm0 = vcmask 1045504   ;;  %vm542_vm1 = vcmask 375808   ;;  %s2897_s1 = inlined_call_operand.vmem [shape: f32[686,686], index: 1, kind: input, shape index: {}]   ;;  %s2898_s0 = inlined_call_operand.vmem [shape: f32[8,686], index: 0, kind: input, shape index: {}]   ;;  %s2899_s2 = inlined_call_operand.vmem [shape: f32[8,1], index: 2, kind: input, shape index: {}]   ;;  %s2900_s3 = inlined_call_operand.vmem [shape: f32[8,686], index: 3, kind: output, shape index: {}]  }
   0x1   :  { %v111_v0 = vld [vmem:[%s2897_s1 + $0x2d8] sm:$0xff]  ;;  %v110_v1 = vld [vmem:[%s2897_s1 + $0x2d0] sm:$0xff]  ;;  %v105_v2 = vld [vmem:[%s2897_s1 + $0x2a8] sm:$0xff] }
   0x2   :  { %565 = vmatprep.subr.mxu0 %v111_v0  ;;  %v303_v3 = vld [vmem:[%s2897_s1 + $0x8d8] sm:$0xff]  ;;  %v104_v4 = vld [vmem:[%s2897_s1 + $0x2a0] sm:$0xff]  ;;  %v302_v5 = vld [vmem:[%s2897_s1 + $0x8d0] sm:$0xff] }
   0x3   :  { %566 = vmatpush1.msra.mxu0 %v110_v1  ;;  %636 = vmatprep.subr.mxu1 %v303_v3  ;;  %v99_v6 = vld [vmem:[%s2897_s1 + $0x278] sm:$0xff]  ;;  %v297_v7 = vld [vmem:[%s2897_s1 + $0x8a8] sm:$0xff]  ;;  %v98_v8 = vld [vmem:[%s2897_s1 + $0x270] sm:$0xff] }
   0x4   :  { %567 = vmatprep.subr.mxu0 %v105_v2  ;;  %637 = vmatpush1.msra.mxu1 %v302_v5  ;;  %v296_v9 = vld [vmem:[%s2897_s1 + $0x8a0] sm:$0xff]  ;;  %v291_v10 = vld [vmem:[%s2897_s1 + $0x878] sm:$0xff]  ;;  %v93_v11 = vld [vmem:[%s2897_s1 + $0x248] sm:$0xff] }
   0x5   :  { %568 = vmatpush1.msra.mxu0 %v104_v4  ;;  %638 = vmatprep.subr.mxu1 %v297_v7  ;;  %v290_v12 = vld [vmem:[%s2897_s1 + $0x870] sm:$0xff]  ;;  %v92_v13 = vld [vmem:[%s2897_s1 + $0x240] sm:$0xff]  ;;  %v285_v14 = vld [vmem:[%s2897_s1 + $0x848] sm:$0xff] }
   0x6   :  { %569 = vmatprep.subr.mxu0 %v99_v6  ;;  %639 = vmatpush1.msra.mxu1 %v296_v9  ;;  %v87_v15 = vld [vmem:[%s2897_s1 + $0x218] sm:$0xff]  ;;  %v284_v16 = vld [vmem:[%s2897_s1 + $0x840] sm:$0xff]  ;;  %v86_v17 = vld [vmem:[%s2897_s1 + $0x210] sm:$0xff] }
   0x7   :  { %570 = vmatpush1.msra.mxu0 %v98_v8  ;;  %640 = vmatprep.subr.mxu1 %v291_v10  ;;  %v279_v18 = vld [vmem:[%s2897_s1 + $0x818] sm:$0xff]  ;;  %v81_v19 = vld [vmem:[%s2897_s1 + $0x1e8] sm:$0xff]  ;;  %v278_v20 = vld [vmem:[%s2897_s1 + $0x810] sm:$0xff] }
   0x8   :  { %571 = vmatprep.subr.mxu0 %v93_v11  ;;  %641 = vmatpush1.msra.mxu1 %v290_v12  ;;  %v80_v21 = vld [vmem:[%s2897_s1 + $0x1e0] sm:$0xff]  ;;  %v273_v22 = vld [vmem:[%s2897_s1 + $0x7e8] sm:$0xff]  ;;  %v75_v23 = vld [vmem:[%s2897_s1 + $0x1b8] sm:$0xff] }
   0x9   :  { %572 = vmatpush1.msra.mxu0 %v92_v13  ;;  %642 = vmatprep.subr.mxu1 %v285_v14  ;;  %v272_v24 = vld [vmem:[%s2897_s1 + $0x7e0] sm:$0xff]  ;;  %v74_v25 = vld [vmem:[%s2897_s1 + $0x1b0] sm:$0xff]  ;;  %v267_v26 = vld [vmem:[%s2897_s1 + $0x7b8] sm:$0xff] }
   0xa   :  { %573 = vmatprep.subr.mxu0 %v87_v15  ;;  %643 = vmatpush1.msra.mxu1 %v284_v16  ;;  %v69_v27 = vld [vmem:[%s2897_s1 + $0x188] sm:$0xff]  ;;  %v266_v28 = vld [vmem:[%s2897_s1 + $0x7b0] sm:$0xff]  ;;  %v68_v29 = vld [vmem:[%s2897_s1 + $0x180] sm:$0xff] }
   0xb   :  { %574 = vmatpush1.msra.mxu0 %v86_v17  ;;  %644 = vmatprep.subr.mxu1 %v279_v18  ;;  %v261_v30 = vld [vmem:[%s2897_s1 + $0x788] sm:$0xff]  ;;  %v63_v31 = vld [vmem:[%s2897_s1 + $0x158] sm:$0xff]  ;;  %v260_v32 = vld [vmem:[%s2897_s1 + $0x780] sm:$0xff] }
   0xc   :  { %575 = vmatprep.subr.mxu0 %v81_v19  ;;  %645 = vmatpush1.msra.mxu1 %v278_v20  ;;  %v62_v33 = vld [vmem:[%s2897_s1 + $0x150] sm:$0xff]  ;;  %v255_v34 = vld [vmem:[%s2897_s1 + $0x758] sm:$0xff]  ;;  %v57_v35 = vld [vmem:[%s2897_s1 + $0x128] sm:$0xff] }
   0xd   :  { %576 = vmatpush1.msra.mxu0 %v80_v21  ;;  %646 = vmatprep.subr.mxu1 %v273_v22  ;;  %v254_v36 = vld [vmem:[%s2897_s1 + $0x750] sm:$0xff]  ;;  %v56_v37 = vld [vmem:[%s2897_s1 + $0x120] sm:$0xff]  ;;  %v249_v38 = vld [vmem:[%s2897_s1 + $0x728] sm:$0xff] }
   0xe   :  { %577 = vmatprep.subr.mxu0 %v75_v23  ;;  %647 = vmatpush1.msra.mxu1 %v272_v24  ;;  %v51_v39 = vld [vmem:[%s2897_s1 + $0xf8] sm:$0xff]  ;;  %v248_v40 = vld [vmem:[%s2897_s1 + $0x720] sm:$0xff]  ;;  %v50_v41 = vld [vmem:[%s2897_s1 + $0xf0] sm:$0xff] }
   0xf   :  { %578 = vmatpush1.msra.mxu0 %v74_v25  ;;  %648 = vmatprep.subr.mxu1 %v267_v26  ;;  %v243_v42 = vld [vmem:[%s2897_s1 + $0x6f8] sm:$0xff]  ;;  %v45_v43 = vld [vmem:[%s2897_s1 + $0xc8] sm:$0xff]  ;;  %v242_v44 = vld [vmem:[%s2897_s1 + $0x6f0] sm:$0xff] }
  0x10   :  { %579 = vmatprep.subr.mxu0 %v69_v27  ;;  %649 = vmatpush1.msra.mxu1 %v266_v28  ;;  %v44_v45 = vld [vmem:[%s2897_s1 + $0xc0] sm:$0xff]  ;;  %v237_v46 = vld [vmem:[%s2897_s1 + $0x6c8] sm:$0xff]  ;;  %v39_v47 = vld [vmem:[%s2897_s1 + $0x98] sm:$0xff] }
  0x11   :  { %580 = vmatpush1.msra.mxu0 %v68_v29  ;;  %650 = vmatprep.subr.mxu1 %v261_v30  ;;  %v236_v48 = vld [vmem:[%s2897_s1 + $0x6c0] sm:$0xff]  ;;  %v38_v49 = vld [vmem:[%s2897_s1 + $0x90] sm:$0xff]  ;;  %v231_v50 = vld [vmem:[%s2897_s1 + $0x698] sm:$0xff] }
  0x12   :  { %581 = vmatprep.subr.mxu0 %v63_v31  ;;  %651 = vmatpush1.msra.mxu1 %v260_v32  ;;  %v33_v51 = vld [vmem:[%s2897_s1 + $0x68] sm:$0xff]  ;;  %v230_v52 = vld [vmem:[%s2897_s1 + $0x690] sm:$0xff]  ;;  %v32_v53 = vld [vmem:[%s2897_s1 + $0x60] sm:$0xff] }
  0x13   :  { %582 = vmatpush1.msra.mxu0 %v62_v33  ;;  %652 = vmatprep.subr.mxu1 %v255_v34  ;;  %v225_v54 = vld [vmem:[%s2897_s1 + $0x668] sm:$0xff]  ;;  %v27_v55 = vld [vmem:[%s2897_s1 + $0x38] sm:$0xff]  ;;  %v224_v56 = vld [vmem:[%s2897_s1 + $0x660] sm:$0xff] }
  0x14   :  { %583 = vmatprep.subr.mxu0 %v57_v35  ;;  %653 = vmatpush1.msra.mxu1 %v254_v36  ;;  %v26_v57 = vld [vmem:[%s2897_s1 + $0x30] sm:$0xff]  ;;  %v219_v58 = vld [vmem:[%s2897_s1 + $0x638] sm:$0xff]  ;;  %v21_v59 = vld [vmem:[%s2897_s1 + $0x8] sm:$0xff] }
  0x15   :  { %584 = vmatpush1.msra.mxu0 %v56_v37  ;;  %654 = vmatprep.subr.mxu1 %v249_v38  ;;  %v218_v60 = vld [vmem:[%s2897_s1 + $0x630] sm:$0xff]  ;;  %v20_v61 = vld [vmem:[%s2897_s1] sm:$0xff]  ;;  %v213_v62 = vld [vmem:[%s2897_s1 + $0x608] sm:$0xff] }
  0x16   :  { %585 = vmatprep.subr.mxu0 %v51_v39  ;;  %655 = vmatpush1.msra.mxu1 %v248_v40  ;;  %v207_v63 = vld [vmem:[%s2897_s1 + $0x5d8] sm:$0xff]  ;;  %v212_v0 = vld [vmem:[%s2897_s1 + $0x600] sm:$0xff]  ;;  %v206_v1 = vld [vmem:[%s2897_s1 + $0x5d0] sm:$0xff] }
  0x17   :  { %586 = vmatpush1.msra.mxu0 %v50_v41  ;;  %656 = vmatprep.subr.mxu1 %v243_v42  ;;  %v399_v2 = vld [vmem:[%s2897_s1 + $0xbd8] sm:$0xff]  ;;  %v201_v3 = vld [vmem:[%s2897_s1 + $0x5a8] sm:$0xff]  ;;  %v398_v4 = vld [vmem:[%s2897_s1 + $0xbd0] sm:$0xff] }
  0x18   :  { %587 = vmatprep.subr.mxu0 %v45_v43  ;;  %657 = vmatpush1.msra.mxu1 %v242_v44  ;;  %v200_v5 = vld [vmem:[%s2897_s1 + $0x5a0] sm:$0xff]  ;;  %v393_v6 = vld [vmem:[%s2897_s1 + $0xba8] sm:$0xff]  ;;  %v195_v7 = vld [vmem:[%s2897_s1 + $0x578] sm:$0xff] }
  0x19   :  { %588 = vmatpush1.msra.mxu0 %v44_v45  ;;  %658 = vmatprep.subr.mxu1 %v237_v46  ;;  %v392_v8 = vld [vmem:[%s2897_s1 + $0xba0] sm:$0xff]  ;;  %v194_v9 = vld [vmem:[%s2897_s1 + $0x570] sm:$0xff]  ;;  %v387_v10 = vld [vmem:[%s2897_s1 + $0xb78] sm:$0xff] }
  0x1a   :  { %589 = vmatprep.subr.mxu0 %v39_v47  ;;  %659 = vmatpush1.msra.mxu1 %v236_v48  ;;  %v189_v11 = vld [vmem:[%s2897_s1 + $0x548] sm:$0xff]  ;;  %v386_v12 = vld [vmem:[%s2897_s1 + $0xb70] sm:$0xff]  ;;  %v188_v13 = vld [vmem:[%s2897_s1 + $0x540] sm:$0xff] }
  0x1b   :  { %590 = vmatpush1.msra.mxu0 %v38_v49  ;;  %660 = vmatprep.subr.mxu1 %v231_v50  ;;  %v381_v14 = vld [vmem:[%s2897_s1 + $0xb48] sm:$0xff]  ;;  %v183_v15 = vld [vmem:[%s2897_s1 + $0x518] sm:$0xff]  ;;  %v380_v16 = vld [vmem:[%s2897_s1 + $0xb40] sm:$0xff] }
  0x1c   :  { %591 = vmatprep.subr.mxu0 %v33_v51  ;;  %661 = vmatpush1.msra.mxu1 %v230_v52  ;;  %v182_v17 = vld [vmem:[%s2897_s1 + $0x510] sm:$0xff]  ;;  %v375_v18 = vld [vmem:[%s2897_s1 + $0xb18] sm:$0xff]  ;;  %v177_v19 = vld [vmem:[%s2897_s1 + $0x4e8] sm:$0xff] }
  0x1d   :  { %592 = vmatpush1.msra.mxu0 %v32_v53  ;;  %662 = vmatprep.subr.mxu1 %v225_v54  ;;  %v374_v20 = vld [vmem:[%s2897_s1 + $0xb10] sm:$0xff]  ;;  %v176_v21 = vld [vmem:[%s2897_s1 + $0x4e0] sm:$0xff]  ;;  %v369_v22 = vld [vmem:[%s2897_s1 + $0xae8] sm:$0xff] }
  0x1e   :  { %593 = vmatprep.subr.mxu0 %v27_v55  ;;  %663 = vmatpush1.msra.mxu1 %v224_v56  ;;  %v171_v23 = vld [vmem:[%s2897_s1 + $0x4b8] sm:$0xff]  ;;  %v368_v24 = vld [vmem:[%s2897_s1 + $0xae0] sm:$0xff]  ;;  %v170_v25 = vld [vmem:[%s2897_s1 + $0x4b0] sm:$0xff] }
  0x1f   :  { %594 = vmatpush1.msra.mxu0 %v26_v57  ;;  %664 = vmatprep.subr.mxu1 %v219_v58  ;;  %v363_v26 = vld [vmem:[%s2897_s1 + $0xab8] sm:$0xff]  ;;  %v165_v27 = vld [vmem:[%s2897_s1 + $0x488] sm:$0xff]  ;;  %v362_v28 = vld [vmem:[%s2897_s1 + $0xab0] sm:$0xff] }
  0x20   :  { %595 = vmatprep.subr.mxu0 %v21_v59  ;;  %665 = vmatpush1.msra.mxu1 %v218_v60  ;;  %v164_v29 = vld [vmem:[%s2897_s1 + $0x480] sm:$0xff]  ;;  %v357_v30 = vld [vmem:[%s2897_s1 + $0xa88] sm:$0xff]  ;;  %v159_v31 = vld [vmem:[%s2897_s1 + $0x458] sm:$0xff] }
  0x21   :  { %596 = vmatpush1.msra.mxu0 %v20_v61  ;;  %666 = vmatprep.subr.mxu1 %v213_v62  ;;  %v356_v32 = vld [vmem:[%s2897_s1 + $0xa80] sm:$0xff]  ;;  %v158_v33 = vld [vmem:[%s2897_s1 + $0x450] sm:$0xff]  ;;  %v351_v34 = vld [vmem:[%s2897_s1 + $0xa58] sm:$0xff] }
  0x22   :  { %597 = vmatprep.subr.mxu0 %v207_v63  ;;  %667 = vmatpush1.msra.mxu1 %v212_v0  ;;  %v153_v35 = vld [vmem:[%s2897_s1 + $0x428] sm:$0xff]  ;;  %v350_v36 = vld [vmem:[%s2897_s1 + $0xa50] sm:$0xff]  ;;  %v152_v37 = vld [vmem:[%s2897_s1 + $0x420] sm:$0xff] }
  0x23   :  { %598 = vmatpush2.msra.mxu0 %v206_v1  ;;  %668 = vmatprep.subr.mxu1 %v399_v2  ;;  %v345_v38 = vld [vmem:[%s2897_s1 + $0xa28] sm:$0xff]  ;;  %v147_v39 = vld [vmem:[%s2897_s1 + $0x3f8] sm:$0xff]  ;;  %v344_v40 = vld [vmem:[%s2897_s1 + $0xa20] sm:$0xff] }
  0x24   :  { %599 = vmatprep.subr.mxu0 %v201_v3  ;;  %669 = vmatpush2.msra.mxu1 %v398_v4  ;;  %v146_v41 = vld [vmem:[%s2897_s1 + $0x3f0] sm:$0xff]  ;;  %v339_v42 = vld [vmem:[%s2897_s1 + $0x9f8] sm:$0xff]  ;;  %v141_v43 = vld [vmem:[%s2897_s1 + $0x3c8] sm:$0xff] }
  0x25   :  { %600 = vmatpush2.msra.mxu0 %v200_v5  ;;  %670 = vmatprep.subr.mxu1 %v393_v6  ;;  %v338_v44 = vld [vmem:[%s2897_s1 + $0x9f0] sm:$0xff]  ;;  %v140_v45 = vld [vmem:[%s2897_s1 + $0x3c0] sm:$0xff]  ;;  %v333_v46 = vld [vmem:[%s2897_s1 + $0x9c8] sm:$0xff] }
  0x26   :  { %601 = vmatprep.subr.mxu0 %v195_v7  ;;  %671 = vmatpush2.msra.mxu1 %v392_v8  ;;  %v135_v47 = vld [vmem:[%s2897_s1 + $0x398] sm:$0xff]  ;;  %v332_v48 = vld [vmem:[%s2897_s1 + $0x9c0] sm:$0xff]  ;;  %v134_v49 = vld [vmem:[%s2897_s1 + $0x390] sm:$0xff] }
  0x27   :  { %602 = vmatpush2.msra.mxu0 %v194_v9  ;;  %672 = vmatprep.subr.mxu1 %v387_v10  ;;  %v327_v50 = vld [vmem:[%s2897_s1 + $0x998] sm:$0xff]  ;;  %v129_v51 = vld [vmem:[%s2897_s1 + $0x368] sm:$0xff]  ;;  %v326_v52 = vld [vmem:[%s2897_s1 + $0x990] sm:$0xff] }
  0x28   :  { %603 = vmatprep.subr.mxu0 %v189_v11  ;;  %673 = vmatpush2.msra.mxu1 %v386_v12  ;;  %v128_v53 = vld [vmem:[%s2897_s1 + $0x360] sm:$0xff]  ;;  %v321_v54 = vld [vmem:[%s2897_s1 + $0x968] sm:$0xff]  ;;  %v123_v55 = vld [vmem:[%s2897_s1 + $0x338] sm:$0xff] }
  0x29   :  { %604 = vmatpush2.msra.mxu0 %v188_v13  ;;  %674 = vmatprep.subr.mxu1 %v381_v14  ;;  %v320_v56 = vld [vmem:[%s2897_s1 + $0x960] sm:$0xff]  ;;  %v122_v57 = vld [vmem:[%s2897_s1 + $0x330] sm:$0xff]  ;;  %v315_v58 = vld [vmem:[%s2897_s1 + $0x938] sm:$0xff] }
  0x2a   :  { %605 = vmatprep.subr.mxu0 %v183_v15  ;;  %675 = vmatpush2.msra.mxu1 %v380_v16  ;;  %v117_v59 = vld [vmem:[%s2897_s1 + $0x308] sm:$0xff]  ;;  %v116_v61 = vld [vmem:[%s2897_s1 + $0x300] sm:$0xff]  ;;  %v314_v62 = vld [vmem:[%s2897_s1 + $0x930] sm:$0xff] }
  0x2b   :  { %606 = vmatpush2.msra.mxu0 %v182_v17  ;;  %676 = vmatprep.subr.mxu1 %v375_v18  ;;  %v1633_v60 = vld [vmem:[%s2898_s0 + $0x8] sm:$0xff]  ;;  %v1644_v63 = vld [vmem:[%s2898_s0] sm:$0xff]  ;;  %v495_v1 = vld [vmem:[%s2897_s1 + $0xed8] sm:$0xff] }
  0x2c   :  { %607 = vmatprep.subr.mxu0 %v177_v19  ;;  %677 = vmatpush2.msra.mxu1 %v374_v20  ;;  %v309_v0 = vld [vmem:[%s2897_s1 + $0x908] sm:$0xff]  ;;  %v308_v2 = vld [vmem:[%s2897_s1 + $0x900] sm:$0xff]  ;;  %v1659_v3 = vld [vmem:[%s2898_s0 + $0x18] sm:$0xff] }
  0x2d   :  { %608 = vmatpush2.msra.mxu0 %v176_v21  ;;  %678 = vmatprep.subr.mxu1 %v369_v22  ;;  %v494_v4 = vld [vmem:[%s2897_s1 + $0xed0] sm:$0xff]  ;;  %v489_v6 = vld [vmem:[%s2897_s1 + $0xea8] sm:$0xff]  ;;  %v488_v8 = vld [vmem:[%s2897_s1 + $0xea0] sm:$0xff] }
  0x2e   :  { %609 = vmatprep.subr.mxu0 %v171_v23  ;;  %679 = vmatpush2.msra.mxu1 %v368_v24  ;;  %v1668_v5 = vld [vmem:[%s2898_s0 + $0x10] sm:$0xff]  ;;  %v113_v7 = vld [vmem:[%s2897_s1 + $0x2e8] sm:$0xff]  ;;  %v112_v9 = vld [vmem:[%s2897_s1 + $0x2e0] sm:$0xff] }
  0x2f   :  { %610 = vmatpush2.msra.mxu0 %v170_v25  ;;  %680 = vmatprep.subr.mxu1 %v363_v26  ;;  %v483_v10 = vld [vmem:[%s2897_s1 + $0xe78] sm:$0xff]  ;;  %v482_v12 = vld [vmem:[%s2897_s1 + $0xe70] sm:$0xff]  ;;  %v477_v14 = vld [vmem:[%s2897_s1 + $0xe48] sm:$0xff] }
  0x30   :  { %611 = vmatprep.subr.mxu0 %v165_v27  ;;  %681 = vmatpush2.msra.mxu1 %v362_v28  ;;  %v107_v11 = vld [vmem:[%s2897_s1 + $0x2b8] sm:$0xff]  ;;  %v106_v13 = vld [vmem:[%s2897_s1 + $0x2b0] sm:$0xff]  ;;  %v101_v15 = vld [vmem:[%s2897_s1 + $0x288] sm:$0xff] }
  0x31   :  { %612 = vmatpush2.msra.mxu0 %v164_v29  ;;  %682 = vmatprep.subr.mxu1 %v357_v30  ;;  %v476_v16 = vld [vmem:[%s2897_s1 + $0xe40] sm:$0xff]  ;;  %v471_v18 = vld [vmem:[%s2897_s1 + $0xe18] sm:$0xff]  ;;  %v470_v20 = vld [vmem:[%s2897_s1 + $0xe10] sm:$0xff] }
  0x32   :  { %613 = vmatprep.subr.mxu0 %v159_v31  ;;  %683 = vmatpush2.msra.mxu1 %v356_v32  ;;  %v100_v17 = vld [vmem:[%s2897_s1 + $0x280] sm:$0xff]  ;;  %v95_v19 = vld [vmem:[%s2897_s1 + $0x258] sm:$0xff]  ;;  %v94_v21 = vld [vmem:[%s2897_s1 + $0x250] sm:$0xff] }
  0x33   :  { %614 = vmatpush2.msra.mxu0 %v158_v33  ;;  %684 = vmatprep.subr.mxu1 %v351_v34  ;;  %v465_v22 = vld [vmem:[%s2897_s1 + $0xde8] sm:$0xff]  ;;  %v464_v24 = vld [vmem:[%s2897_s1 + $0xde0] sm:$0xff]  ;;  %v459_v26 = vld [vmem:[%s2897_s1 + $0xdb8] sm:$0xff] }
  0x34   :  { %615 = vmatprep.subr.mxu0 %v153_v35  ;;  %685 = vmatpush2.msra.mxu1 %v350_v36  ;;  %v89_v23 = vld [vmem:[%s2897_s1 + $0x228] sm:$0xff]  ;;  %v88_v25 = vld [vmem:[%s2897_s1 + $0x220] sm:$0xff]  ;;  %v83_v27 = vld [vmem:[%s2897_s1 + $0x1f8] sm:$0xff] }
  0x35   :  { %616 = vmatpush2.msra.mxu0 %v152_v37  ;;  %686 = vmatprep.subr.mxu1 %v345_v38  ;;  %v458_v28 = vld [vmem:[%s2897_s1 + $0xdb0] sm:$0xff]  ;;  %v453_v30 = vld [vmem:[%s2897_s1 + $0xd88] sm:$0xff]  ;;  %v452_v32 = vld [vmem:[%s2897_s1 + $0xd80] sm:$0xff] }
  0x36   :  { %617 = vmatprep.subr.mxu0 %v147_v39  ;;  %687 = vmatpush2.msra.mxu1 %v344_v40  ;;  %v82_v29 = vld [vmem:[%s2897_s1 + $0x1f0] sm:$0xff]  ;;  %v77_v31 = vld [vmem:[%s2897_s1 + $0x1c8] sm:$0xff]  ;;  %v76_v33 = vld [vmem:[%s2897_s1 + $0x1c0] sm:$0xff] }
  0x37   :  { %618 = vmatpush2.msra.mxu0 %v146_v41  ;;  %688 = vmatprep.subr.mxu1 %v339_v42  ;;  %v447_v34 = vld [vmem:[%s2897_s1 + $0xd58] sm:$0xff]  ;;  %v446_v36 = vld [vmem:[%s2897_s1 + $0xd50] sm:$0xff]  ;;  %v441_v38 = vld [vmem:[%s2897_s1 + $0xd28] sm:$0xff] }
  0x38   :  { %619 = vmatprep.subr.mxu0 %v141_v43  ;;  %689 = vmatpush2.msra.mxu1 %v338_v44  ;;  %v71_v35 = vld [vmem:[%s2897_s1 + $0x198] sm:$0xff]  ;;  %v70_v37 = vld [vmem:[%s2897_s1 + $0x190] sm:$0xff]  ;;  %v65_v39 = vld [vmem:[%s2897_s1 + $0x168] sm:$0xff] }
  0x39   :  { %620 = vmatpush2.msra.mxu0 %v140_v45  ;;  %690 = vmatprep.subr.mxu1 %v333_v46  ;;  %v440_v40 = vld [vmem:[%s2897_s1 + $0xd20] sm:$0xff]  ;;  %v435_v42 = vld [vmem:[%s2897_s1 + $0xcf8] sm:$0xff]  ;;  %v434_v44 = vld [vmem:[%s2897_s1 + $0xcf0] sm:$0xff] }
  0x3a   :  { %621 = vmatprep.subr.mxu0 %v135_v47  ;;  %691 = vmatpush2.msra.mxu1 %v332_v48  ;;  %v64_v41 = vld [vmem:[%s2897_s1 + $0x160] sm:$0xff]  ;;  %v59_v43 = vld [vmem:[%s2897_s1 + $0x138] sm:$0xff]  ;;  %v58_v45 = vld [vmem:[%s2897_s1 + $0x130] sm:$0xff] }
  0x3b   :  { %622 = vmatpush2.msra.mxu0 %v134_v49  ;;  %692 = vmatprep.subr.mxu1 %v327_v50  ;;  %v429_v46 = vld [vmem:[%s2897_s1 + $0xcc8] sm:$0xff]  ;;  %v428_v48 = vld [vmem:[%s2897_s1 + $0xcc0] sm:$0xff]  ;;  %v423_v50 = vld [vmem:[%s2897_s1 + $0xc98] sm:$0xff] }
  0x3c   :  { %623 = vmatprep.subr.mxu0 %v129_v51  ;;  %693 = vmatpush2.msra.mxu1 %v326_v52  ;;  %v53_v47 = vld [vmem:[%s2897_s1 + $0x108] sm:$0xff]  ;;  %v52_v49 = vld [vmem:[%s2897_s1 + $0x100] sm:$0xff]  ;;  %v47_v51 = vld [vmem:[%s2897_s1 + $0xd8] sm:$0xff] }
  0x3d   :  { %624 = vmatpush2.msra.mxu0 %v128_v53  ;;  %694 = vmatprep.subr.mxu1 %v321_v54  ;;  %v422_v52 = vld [vmem:[%s2897_s1 + $0xc90] sm:$0xff]  ;;  %v417_v54 = vld [vmem:[%s2897_s1 + $0xc68] sm:$0xff] }
  0x3e   :  { %625 = vmatprep.subr.mxu0 %v123_v55  ;;  %695 = vmatpush2.msra.mxu1 %v320_v56  ;;  %v46_v53 = vld [vmem:[%s2897_s1 + $0xd0] sm:$0xff]  ;;  %v41_v55 = vld [vmem:[%s2897_s1 + $0xa8] sm:$0xff]  ;;  %v416_v56 = vld [vmem:[%s2897_s1 + $0xc60] sm:$0xff] }
  0x3f   :  { %626 = vmatpush2.msra.mxu0 %v122_v57  ;;  %696 = vmatprep.subr.mxu1 %v315_v58  ;;  %v40_v57 = vld [vmem:[%s2897_s1 + $0xa0] sm:$0xff]  ;;  %v411_v58 = vld [vmem:[%s2897_s1 + $0xc38] sm:$0xff] }
  0x40   :  { %627 = vmatprep.subr.mxu0 %v117_v59  ;;  %629 = vmatprep.mubr.f32.mxu0 %v1633_v60  ;;  %v35_v59 = vld [vmem:[%s2897_s1 + $0x78] sm:$0xff] }
  0x41   :  { %628 = vmatpush2.msra.mxu0 %v116_v61  ;;  %697 = vmatpush2.msra.mxu1 %v314_v62  ;;  %v410_v61 = vld [vmem:[%s2897_s1 + $0xc30] sm:$0xff] }
  0x42   :  { %630 = vmatmul.mubr.f32.vlgmr.msra.gmra.mxu0 %v1644_v63  ;;  %698 = vmatprep.subr.mxu1 %v309_v0  ;;  %v34_v62 = vld [vmem:[%s2897_s1 + $0x70] sm:$0xff]  ;;  %v405_v0 = vld [vmem:[%s2897_s1 + $0xc08] sm:$0xff] }
  0x43   :  { %707 = vmatprep.subr.mxu0 %v495_v1  ;;  %699 = vmatpush2.msra.mxu1 %v308_v2  ;;  %v29_v1 = vld [vmem:[%s2897_s1 + $0x48] sm:$0xff]  ;;  %v404_v2 = vld [vmem:[%s2897_s1 + $0xc00] sm:$0xff] }
  0x44   :  { %700 = vmatprep.mubr.f32.mxu1 %v1659_v3  ;;  %708 = vmatpush1.msra.mxu0 %v494_v4  ;;  %v28_v4 = vld [vmem:[%s2897_s1 + $0x40] sm:$0xff] }
  0x45   :  { %701 = vmatmul.mubr.f32.vlgmr.msra.gmra.mxu1 %v1668_v5  ;;  %709 = vmatprep.subr.mxu0 %v489_v6  ;;  %v531_v6 = vld [vmem:[%s2897_s1 + $0xff8] sm:$0x3f] }
  0x46   :  { %778 = vmatprep.subr.mxu1 %v113_v7  ;;  %710 = vmatpush1.msra.mxu0 %v488_v8  ;;  %v23_v7 = vld [vmem:[%s2897_s1 + $0x18] sm:$0xff]  ;;  %v530_v8 = vld [vmem:[%s2897_s1 + $0xff0] sm:$0x3f] }
  0x47   :  { %779 = vmatpush1.msra.mxu1 %v112_v9  ;;  %711 = vmatprep.subr.mxu0 %v483_v10  ;;  %v22_v9 = vld [vmem:[%s2897_s1 + $0x10] sm:$0xff]  ;;  %v525_v10 = vld [vmem:[%s2897_s1 + $0xfc8] sm:$0xff] }
  0x48   :  { %780 = vmatprep.subr.mxu1 %v107_v11  ;;  %712 = vmatpush1.msra.mxu0 %v482_v12  ;;  %v209_v11 = vld [vmem:[%s2897_s1 + $0x5e8] sm:$0xff]  ;;  %v524_v12 = vld [vmem:[%s2897_s1 + $0xfc0] sm:$0xff] }
  0x49   :  { %781 = vmatpush1.msra.mxu1 %v106_v13  ;;  %713 = vmatprep.subr.mxu0 %v477_v14  ;;  %v208_v13 = vld [vmem:[%s2897_s1 + $0x5e0] sm:$0xff]  ;;  %v519_v14 = vld [vmem:[%s2897_s1 + $0xf98] sm:$0xff] }
  0x4a   :  { %782 = vmatprep.subr.mxu1 %v101_v15  ;;  %714 = vmatpush1.msra.mxu0 %v476_v16  ;;  %v203_v15 = vld [vmem:[%s2897_s1 + $0x5b8] sm:$0xff]  ;;  %v518_v16 = vld [vmem:[%s2897_s1 + $0xf90] sm:$0xff] }
  0x4b   :  { %783 = vmatpush1.msra.mxu1 %v100_v17  ;;  %715 = vmatprep.subr.mxu0 %v471_v18  ;;  %v202_v17 = vld [vmem:[%s2897_s1 + $0x5b0] sm:$0xff]  ;;  %v513_v18 = vld [vmem:[%s2897_s1 + $0xf68] sm:$0xff] }
  0x4c   :  { %784 = vmatprep.subr.mxu1 %v95_v19  ;;  %716 = vmatpush1.msra.mxu0 %v470_v20  ;;  %v197_v19 = vld [vmem:[%s2897_s1 + $0x588] sm:$0xff]  ;;  %v512_v20 = vld [vmem:[%s2897_s1 + $0xf60] sm:$0xff] }
  0x4d   :  { %785 = vmatpush1.msra.mxu1 %v94_v21  ;;  %717 = vmatprep.subr.mxu0 %v465_v22  ;;  %v196_v21 = vld [vmem:[%s2897_s1 + $0x580] sm:$0xff]  ;;  %v507_v22 = vld [vmem:[%s2897_s1 + $0xf38] sm:$0xff] }
  0x4e   :  { %786 = vmatprep.subr.mxu1 %v89_v23  ;;  %718 = vmatpush1.msra.mxu0 %v464_v24  ;;  %v191_v23 = vld [vmem:[%s2897_s1 + $0x558] sm:$0xff]  ;;  %v506_v24 = vld [vmem:[%s2897_s1 + $0xf30] sm:$0xff] }
  0x4f   :  { %787 = vmatpush1.msra.mxu1 %v88_v25  ;;  %719 = vmatprep.subr.mxu0 %v459_v26  ;;  %v190_v25 = vld [vmem:[%s2897_s1 + $0x550] sm:$0xff]  ;;  %v501_v26 = vld [vmem:[%s2897_s1 + $0xf08] sm:$0xff] }
  0x50   :  { %788 = vmatprep.subr.mxu1 %v83_v27  ;;  %720 = vmatpush1.msra.mxu0 %v458_v28  ;;  %v185_v27 = vld [vmem:[%s2897_s1 + $0x528] sm:$0xff]  ;;  %v500_v28 = vld [vmem:[%s2897_s1 + $0xf00] sm:$0xff] }
  0x51   :  { %789 = vmatpush1.msra.mxu1 %v82_v29  ;;  %721 = vmatprep.subr.mxu0 %v453_v30  ;;  %v1926_v29 = vld [vmem:[%s2898_s0 + $0x28] sm:$0xff]  ;;  %v184_v30 = vld [vmem:[%s2897_s1 + $0x520] sm:$0xff] }
  0x52   :  { %790 = vmatprep.subr.mxu1 %v77_v31  ;;  %722 = vmatpush1.msra.mxu0 %v452_v32  ;;  %v1934_v31 = vld [vmem:[%s2898_s0 + $0x20] sm:$0xff]  ;;  %v179_v32 = vld [vmem:[%s2897_s1 + $0x4f8] sm:$0xff] }
  0x53   :  { %791 = vmatpush1.msra.mxu1 %v76_v33  ;;  %723 = vmatprep.subr.mxu0 %v447_v34  ;;  %v305_v33 = vld [vmem:[%s2897_s1 + $0x8e8] sm:$0xff]  ;;  %v178_v34 = vld [vmem:[%s2897_s1 + $0x4f0] sm:$0xff] }
  0x54   :  { %792 = vmatprep.subr.mxu1 %v71_v35  ;;  %724 = vmatpush1.msra.mxu0 %v446_v36  ;;  %v304_v35 = vld [vmem:[%s2897_s1 + $0x8e0] sm:$0xff]  ;;  %v173_v36 = vld [vmem:[%s2897_s1 + $0x4c8] sm:$0xff] }
  0x55   :  { %793 = vmatpush1.msra.mxu1 %v70_v37  ;;  %725 = vmatprep.subr.mxu0 %v441_v38  ;;  %v299_v37 = vld [vmem:[%s2897_s1 + $0x8b8] sm:$0xff]  ;;  %v172_v38 = vld [vmem:[%s2897_s1 + $0x4c0] sm:$0xff] }
  0x56   :  { %794 = vmatprep.subr.mxu1 %v65_v39  ;;  %726 = vmatpush1.msra.mxu0 %v440_v40  ;;  %v298_v39 = vld [vmem:[%s2897_s1 + $0x8b0] sm:$0xff]  ;;  %v167_v40 = vld [vmem:[%s2897_s1 + $0x498] sm:$0xff] }
  0x57   :  { %795 = vmatpush1.msra.mxu1 %v64_v41  ;;  %727 = vmatprep.subr.mxu0 %v435_v42  ;;  %v293_v41 = vld [vmem:[%s2897_s1 + $0x888] sm:$0xff]  ;;  %v166_v42 = vld [vmem:[%s2897_s1 + $0x490] sm:$0xff] }
  0x58   :  { %796 = vmatprep.subr.mxu1 %v59_v43  ;;  %728 = vmatpush1.msra.mxu0 %v434_v44  ;;  %v292_v43 = vld [vmem:[%s2897_s1 + $0x880] sm:$0xff]  ;;  %v161_v44 = vld [vmem:[%s2897_s1 + $0x468] sm:$0xff] }
  0x59   :  { %797 = vmatpush1.msra.mxu1 %v58_v45  ;;  %729 = vmatprep.subr.mxu0 %v429_v46  ;;  %v287_v45 = vld [vmem:[%s2897_s1 + $0x858] sm:$0xff]  ;;  %v160_v46 = vld [vmem:[%s2897_s1 + $0x460] sm:$0xff] }
  0x5a   :  { %798 = vmatprep.subr.mxu1 %v53_v47  ;;  %730 = vmatpush1.msra.mxu0 %v428_v48  ;;  %v286_v47 = vld [vmem:[%s2897_s1 + $0x850] sm:$0xff]  ;;  %v155_v48 = vld [vmem:[%s2897_s1 + $0x438] sm:$0xff] }
  0x5b   :  { %799 = vmatpush1.msra.mxu1 %v52_v49  ;;  %731 = vmatprep.subr.mxu0 %v423_v50  ;;  %v281_v49 = vld [vmem:[%s2897_s1 + $0x828] sm:$0xff]  ;;  %v154_v50 = vld [vmem:[%s2897_s1 + $0x430] sm:$0xff] }
  0x5c   :  { %800 = vmatprep.subr.mxu1 %v47_v51  ;;  %732 = vmatpush1.msra.mxu0 %v422_v52  ;;  %v280_v51 = vld [vmem:[%s2897_s1 + $0x820] sm:$0xff]  ;;  %v149_v52 = vld [vmem:[%s2897_s1 + $0x408] sm:$0xff] }
  0x5d   :  { %801 = vmatpush1.msra.mxu1 %v46_v53  ;;  %733 = vmatprep.subr.mxu0 %v417_v54  ;;  %v275_v53 = vld [vmem:[%s2897_s1 + $0x7f8] sm:$0xff]  ;;  %v148_v54 = vld [vmem:[%s2897_s1 + $0x400] sm:$0xff] }
  0x5e   :  { %802 = vmatprep.subr.mxu1 %v41_v55  ;;  %734 = vmatpush1.msra.mxu0 %v416_v56  ;;  %v274_v55 = vld [vmem:[%s2897_s1 + $0x7f0] sm:$0xff]  ;;  %v143_v56 = vld [vmem:[%s2897_s1 + $0x3d8] sm:$0xff] }
  0x5f   :  { %803 = vmatpush1.msra.mxu1 %v40_v57  ;;  %735 = vmatprep.subr.mxu0 %v411_v58  ;;  %v269_v57 = vld [vmem:[%s2897_s1 + $0x7c8] sm:$0xff]  ;;  %v142_v58 = vld [vmem:[%s2897_s1 + $0x3d0] sm:$0xff] }
  0x60   :  { %804 = vmatprep.subr.mxu1 %v35_v59  ;;  %736 = vmatpush1.msra.mxu0 %v410_v61  ;;  %v268_v59 = vld [vmem:[%s2897_s1 + $0x7c0] sm:$0xff]  ;;  %v137_v61 = vld [vmem:[%s2897_s1 + $0x3a8] sm:$0xff] }
  0x61   :  { %805 = vmatpush1.msra.mxu1 %v34_v62  ;;  %737 = vmatprep.subr.mxu0 %v405_v0  ;;  %v263_v62 = vld [vmem:[%s2897_s1 + $0x798] sm:$0xff]  ;;  %v136_v0 = vld [vmem:[%s2897_s1 + $0x3a0] sm:$0xff] }
  0x62   :  { %806 = vmatprep.subr.mxu1 %v29_v1  ;;  %738 = vmatpush1.msra.mxu0 %v404_v2  ;;  %v262_v1 = vld [vmem:[%s2897_s1 + $0x790] sm:$0xff]  ;;  %v131_v2 = vld [vmem:[%s2897_s1 + $0x378] sm:$0xff] }
  0x63   :  { %807 = vmatpush1.msra.mxu1 %v28_v4  ;;  %1220 = vmatprep.subr.msk.mxu0 %vm546_vm0, %v531_v6  ;;  %v257_v4 = vld [vmem:[%s2897_s1 + $0x768] sm:$0xff]  ;;  %v130_v6 = vld [vmem:[%s2897_s1 + $0x370] sm:$0xff] }
  0x64   :  { %808 = vmatprep.subr.mxu1 %v23_v7  ;;  %1221 = vmatpush2.msk.msra.mxu0 %vm546_vm0, %v530_v8  ;;  %v256_v7 = vld [vmem:[%s2897_s1 + $0x760] sm:$0xff]  ;;  %v125_v8 = vld [vmem:[%s2897_s1 + $0x348] sm:$0xff] }
  0x65   :  { %809 = vmatpush1.msra.mxu1 %v22_v9  ;;  %761 = vmatprep.subr.mxu0 %v525_v10  ;;  %v251_v9 = vld [vmem:[%s2897_s1 + $0x738] sm:$0xff]  ;;  %v124_v10 = vld [vmem:[%s2897_s1 + $0x340] sm:$0xff] }
  0x66   :  { %810 = vmatprep.subr.mxu1 %v209_v11  ;;  %762 = vmatpush2.msra.mxu0 %v524_v12  ;;  %v250_v11 = vld [vmem:[%s2897_s1 + $0x730] sm:$0xff]  ;;  %v119_v12 = vld [vmem:[%s2897_s1 + $0x318] sm:$0xff] }
  0x67   :  { %811 = vmatpush2.msra.mxu1 %v208_v13  ;;  %763 = vmatprep.subr.mxu0 %v519_v14  ;;  %v245_v13 = vld [vmem:[%s2897_s1 + $0x708] sm:$0xff]  ;;  %v118_v14 = vld [vmem:[%s2897_s1 + $0x310] sm:$0xff] }
  0x68   :  { %812 = vmatprep.subr.mxu1 %v203_v15  ;;  %764 = vmatpush2.msra.mxu0 %v518_v16  ;;  %v244_v15 = vld [vmem:[%s2897_s1 + $0x700] sm:$0xff]  ;;  %v239_v16 = vld [vmem:[%s2897_s1 + $0x6d8] sm:$0xff] }
  0x69   :  { %813 = vmatpush2.msra.mxu1 %v202_v17  ;;  %765 = vmatprep.subr.mxu0 %v513_v18  ;;  %v497_v17 = vld [vmem:[%s2897_s1 + $0xee8] sm:$0xff]  ;;  %v238_v18 = vld [vmem:[%s2897_s1 + $0x6d0] sm:$0xff] }
  0x6a   :  { %814 = vmatprep.subr.mxu1 %v197_v19  ;;  %766 = vmatpush2.msra.mxu0 %v512_v20  ;;  %v496_v19 = vld [vmem:[%s2897_s1 + $0xee0] sm:$0xff]  ;;  %v233_v20 = vld [vmem:[%s2897_s1 + $0x6a8] sm:$0xff] }
  0x6b   :  { %815 = vmatpush2.msra.mxu1 %v196_v21  ;;  %767 = vmatprep.subr.mxu0 %v507_v22  ;;  %v491_v21 = vld [vmem:[%s2897_s1 + $0xeb8] sm:$0xff]  ;;  %v490_v22 = vld [vmem:[%s2897_s1 + $0xeb0] sm:$0xff] }
  0x6c   :  { %816 = vmatprep.subr.mxu1 %v191_v23  ;;  %768 = vmatpush2.msra.mxu0 %v506_v24  ;;  %v536_v23 = vld [vmem:[%s2899_s2] sm:$0xff]  ;;  %v227_v24 = vld [vmem:[%s2897_s1 + $0x678] sm:$0xff] }
  0x6d   :  { %817 = vmatpush2.msra.mxu1 %v190_v25  ;;  %769 = vmatprep.subr.mxu0 %v501_v26  ;;  %v485_v25 = vld [vmem:[%s2897_s1 + $0xe88] sm:$0xff]  ;;  %v226_v26 = vld [vmem:[%s2897_s1 + $0x670] sm:$0xff] }
  0x6e   :  { %818 = vmatprep.subr.mxu1 %v185_v27  ;;  %770 = vmatpush2.msra.mxu0 %v500_v28  ;;  %v484_v27 = vld [vmem:[%s2897_s1 + $0xe80] sm:$0xff]  ;;  %v221_v28 = vld [vmem:[%s2897_s1 + $0x648] sm:$0xff] }
  0x6f   :  { %1222 = vmatprep.mubr.msk.f32.mxu0 %vm542_vm1, %v1926_v29  ;;  %819 = vmatpush2.msra.mxu1 %v184_v30  ;;  %v479_v30 = vld [vmem:[%s2897_s1 + $0xe58] sm:$0xff] }
  0x70   :  { %772 = vmatmul.mubr.f32.vlgmr.msra.gmra.mxu0 %v1934_v31  ;;  %820 = vmatprep.subr.mxu1 %v179_v32  ;;  %v220_v32 = vld [vmem:[%s2897_s1 + $0x640] sm:$0xff] }
  0x71   :  { %849 = vmatprep.subr.mxu0 %v305_v33  ;;  %821 = vmatpush2.msra.mxu1 %v178_v34  ;;  %v478_v33 = vld [vmem:[%s2897_s1 + $0xe50] sm:$0xff]  ;;  %v215_v34 = vld [vmem:[%s2897_s1 + $0x618] sm:$0xff] }
  0x72   :  { %850 = vmatpush1.msra.mxu0 %v304_v35  ;;  %822 = vmatprep.subr.mxu1 %v173_v36  ;;  %v473_v35 = vld [vmem:[%s2897_s1 + $0xe28] sm:$0xff]  ;;  %v214_v36 = vld [vmem:[%s2897_s1 + $0x610] sm:$0xff] }
  0x73   :  { %851 = vmatprep.subr.mxu0 %v299_v37  ;;  %823 = vmatpush2.msra.mxu1 %v172_v38  ;;  %v472_v37 = vld [vmem:[%s2897_s1 + $0xe20] sm:$0xff]  ;;  %v401_v38 = vld [vmem:[%s2897_s1 + $0xbe8] sm:$0xff] }
  0x74   :  { %852 = vmatpush1.msra.mxu0 %v298_v39  ;;  %824 = vmatprep.subr.mxu1 %v167_v40  ;;  %v467_v39 = vld [vmem:[%s2897_s1 + $0xdf8] sm:$0xff]  ;;  %v400_v40 = vld [vmem:[%s2897_s1 + $0xbe0] sm:$0xff] }
  0x75   :  { %853 = vmatprep.subr.mxu0 %v293_v41  ;;  %825 = vmatpush2.msra.mxu1 %v166_v42  ;;  %v466_v41 = vld [vmem:[%s2897_s1 + $0xdf0] sm:$0xff]  ;;  %v395_v42 = vld [vmem:[%s2897_s1 + $0xbb8] sm:$0xff] }
  0x76   :  { %854 = vmatpush1.msra.mxu0 %v292_v43  ;;  %826 = vmatprep.subr.mxu1 %v161_v44  ;;  %v461_v43 = vld [vmem:[%s2897_s1 + $0xdc8] sm:$0xff]  ;;  %v394_v44 = vld [vmem:[%s2897_s1 + $0xbb0] sm:$0xff] }
  0x77   :  { %855 = vmatprep.subr.mxu0 %v287_v45  ;;  %827 = vmatpush2.msra.mxu1 %v160_v46  ;;  %v460_v45 = vld [vmem:[%s2897_s1 + $0xdc0] sm:$0xff]  ;;  %v389_v46 = vld [vmem:[%s2897_s1 + $0xb88] sm:$0xff] }
  0x78   :  { %856 = vmatpush1.msra.mxu0 %v286_v47  ;;  %828 = vmatprep.subr.mxu1 %v155_v48  ;;  %v455_v47 = vld [vmem:[%s2897_s1 + $0xd98] sm:$0xff]  ;;  %v388_v48 = vld [vmem:[%s2897_s1 + $0xb80] sm:$0xff] }
  0x79   :  { %857 = vmatprep.subr.mxu0 %v281_v49  ;;  %829 = vmatpush2.msra.mxu1 %v154_v50  ;;  %v454_v49 = vld [vmem:[%s2897_s1 + $0xd90] sm:$0xff]  ;;  %v383_v50 = vld [vmem:[%s2897_s1 + $0xb58] sm:$0xff] }
  0x7a   :  { %858 = vmatpush1.msra.mxu0 %v280_v51  ;;  %830 = vmatprep.subr.mxu1 %v149_v52  ;;  %v449_v51 = vld [vmem:[%s2897_s1 + $0xd68] sm:$0xff]  ;;  %v382_v52 = vld [vmem:[%s2897_s1 + $0xb50] sm:$0xff] }
  0x7b   :  { %859 = vmatprep.subr.mxu0 %v275_v53  ;;  %831 = vmatpush2.msra.mxu1 %v148_v54  ;;  %v448_v53 = vld [vmem:[%s2897_s1 + $0xd60] sm:$0xff]  ;;  %v377_v54 = vld [vmem:[%s2897_s1 + $0xb28] sm:$0xff] }
  0x7c   :  { %860 = vmatpush1.msra.mxu0 %v274_v55  ;;  %832 = vmatprep.subr.mxu1 %v143_v56  ;;  %v443_v55 = vld [vmem:[%s2897_s1 + $0xd38] sm:$0xff]  ;;  %v376_v56 = vld [vmem:[%s2897_s1 + $0xb20] sm:$0xff] }
  0x7d   :  { %861 = vmatprep.subr.mxu0 %v269_v57  ;;  %833 = vmatpush2.msra.mxu1 %v142_v58  ;;  %v442_v57 = vld [vmem:[%s2897_s1 + $0xd30] sm:$0xff]  ;;  %v371_v58 = vld [vmem:[%s2897_s1 + $0xaf8] sm:$0xff] }
  0x7e   :  { %862 = vmatpush1.msra.mxu0 %v268_v59  ;;  %834 = vmatprep.subr.mxu1 %v137_v61  ;;  %v437_v59 = vld [vmem:[%s2897_s1 + $0xd08] sm:$0xff]  ;;  %v370_v61 = vld [vmem:[%s2897_s1 + $0xaf0] sm:$0xff] }
  0x7f   :  { %863 = vmatprep.subr.mxu0 %v263_v62  ;;  %835 = vmatpush2.msra.mxu1 %v136_v0  ;;  %v436_v62 = vld [vmem:[%s2897_s1 + $0xd00] sm:$0xff]  ;;  %v365_v0 = vld [vmem:[%s2897_s1 + $0xac8] sm:$0xff] }
  0x80   :  { %864 = vmatpush1.msra.mxu0 %v262_v1  ;;  %836 = vmatprep.subr.mxu1 %v131_v2  ;;  %v431_v1 = vld [vmem:[%s2897_s1 + $0xcd8] sm:$0xff]  ;;  %v364_v2 = vld [vmem:[%s2897_s1 + $0xac0] sm:$0xff] }
  0x81   :  { %865 = vmatprep.subr.mxu0 %v257_v4  ;;  %837 = vmatpush2.msra.mxu1 %v130_v6  ;;  %v430_v4 = vld [vmem:[%s2897_s1 + $0xcd0] sm:$0xff]  ;;  %v359_v6 = vld [vmem:[%s2897_s1 + $0xa98] sm:$0xff] }
  0x82   :  { %866 = vmatpush1.msra.mxu0 %v256_v7  ;;  %838 = vmatprep.subr.mxu1 %v125_v8  ;;  %v425_v7 = vld [vmem:[%s2897_s1 + $0xca8] sm:$0xff]  ;;  %v358_v8 = vld [vmem:[%s2897_s1 + $0xa90] sm:$0xff] }
  0x83   :  { %867 = vmatprep.subr.mxu0 %v251_v9  ;;  %839 = vmatpush2.msra.mxu1 %v124_v10  ;;  %v424_v9 = vld [vmem:[%s2897_s1 + $0xca0] sm:$0xff]  ;;  %v353_v10 = vld [vmem:[%s2897_s1 + $0xa68] sm:$0xff] }
  0x84   :  { %868 = vmatpush1.msra.mxu0 %v250_v11  ;;  %840 = vmatprep.subr.mxu1 %v119_v12  ;;  %v419_v11 = vld [vmem:[%s2897_s1 + $0xc78] sm:$0xff]  ;;  %v352_v12 = vld [vmem:[%s2897_s1 + $0xa60] sm:$0xff] }
  0x85   :  { %869 = vmatprep.subr.mxu0 %v245_v13  ;;  %841 = vmatpush2.msra.mxu1 %v118_v14  ;;  %v418_v13 = vld [vmem:[%s2897_s1 + $0xc70] sm:$0xff]  ;;  %v347_v14 = vld [vmem:[%s2897_s1 + $0xa38] sm:$0xff] }
  0x86   :  { %870 = vmatpush1.msra.mxu0 %v244_v15  ;;  %842 = vmatprep.mubr.f32.mxu1 %v1633_v60  ;;  %v232_v60 = vld [vmem:[%s2897_s1 + $0x6a0] sm:$0xff]  ;;  %v413_v15 = vld [vmem:[%s2897_s1 + $0xc48] sm:$0xff] }
  0x87   :  { %871 = vmatprep.subr.mxu0 %v239_v16  ;;  %920 = vmatprep.subr.mxu1 %v497_v17  ;;  %v346_v16 = vld [vmem:[%s2897_s1 + $0xa30] sm:$0xff]  ;;  %v412_v17 = vld [vmem:[%s2897_s1 + $0xc40] sm:$0xff] }
  0x88   :  { %843 = vmatmul.mubr.f32.vlgmr.msra.gmra.mxu1 %v1644_v63  ;;  %872 = vmatpush1.msra.mxu0 %v238_v18  ;;  %v1237_v63 = vmov 0   ;;  %v341_v18 = vld [vmem:[%s2897_s1 + $0xa08] sm:$0xff] }
  0x89   :  { %921 = vmatpush1.msra.mxu1 %v496_v19  ;;  %873 = vmatprep.subr.mxu0 %v233_v20  ;;  %v407_v19 = vld [vmem:[%s2897_s1 + $0xc18] sm:$0xff]  ;;  %v340_v20 = vld [vmem:[%s2897_s1 + $0xa00] sm:$0xff] }
  0x8a   :  { %922 = vmatprep.subr.mxu1 %v491_v21  ;;  %1230 = vset.pattern.permute.xlu0 %v1237_v63  ;;  %v406_v21 = vld [vmem:[%s2897_s1 + $0xc10] sm:$0xff]  ;;  %v329_v63 = vld [vmem:[%s2897_s1 + $0x9a8] sm:$0xff] }
  0x8b   :  { %874 = vmatpush1.msra.mxu0 %v232_v60  ;;  %923 = vmatpush1.msra.mxu1 %v490_v22  ;;  %v335_v60 = vld [vmem:[%s2897_s1 + $0x9d8] sm:$0xff]  ;;  %v533_v22 = vld [vmem:[%s2897_s1 + $0x1008] sm:$0x3f] }
  0x8c   :  { %539 = vperm.xlu0 %1230, %v536_v23   ;;  %875 = vmatprep.subr.mxu0 %v227_v24  ;;  %v334_v23 = vld [vmem:[%s2897_s1 + $0x9d0] sm:$0xff]  ;;  %v532_v24 = vld [vmem:[%s2897_s1 + $0x1000] sm:$0x3f] }
  0x8d   :  { %924 = vmatprep.subr.mxu1 %v485_v25  ;;  %876 = vmatpush1.msra.mxu0 %v226_v26  ;;  %v527_v25 = vld [vmem:[%s2897_s1 + $0xfd8] sm:$0xff]  ;;  %v328_v26 = vld [vmem:[%s2897_s1 + $0x9a0] sm:$0xff] }
  0x8e   :  { %925 = vmatpush1.msra.mxu1 %v484_v27  ;;  %877 = vmatprep.subr.mxu0 %v221_v28  ;;  %v526_v27 = vld [vmem:[%s2897_s1 + $0xfd0] sm:$0xff]  ;;  %v323_v28 = vld [vmem:[%s2897_s1 + $0x978] sm:$0xff] }
  0x8f   :  { %926 = vmatprep.subr.mxu1 %v479_v30  ;;  %878 = vmatpush1.msra.mxu0 %v220_v32  ;;  %v521_v30 = vld [vmem:[%s2897_s1 + $0xfa8] sm:$0xff]  ;;  %v322_v32 = vld [vmem:[%s2897_s1 + $0x970] sm:$0xff] }
  0x90   :  { %927 = vmatpush1.msra.mxu1 %v478_v33  ;;  %879 = vmatprep.subr.mxu0 %v215_v34  ;;  %v520_v33 = vld [vmem:[%s2897_s1 + $0xfa0] sm:$0xff]  ;;  %v317_v34 = vld [vmem:[%s2897_s1 + $0x948] sm:$0xff] }
  0x91   :  { %928 = vmatprep.subr.mxu1 %v473_v35  ;;  %880 = vmatpush1.msra.mxu0 %v214_v36  ;;  %v515_v35 = vld [vmem:[%s2897_s1 + $0xf78] sm:$0xff]  ;;  %v316_v36 = vld [vmem:[%s2897_s1 + $0x940] sm:$0xff] }
  0x92   :  { %929 = vmatpush1.msra.mxu1 %v472_v37  ;;  %881 = vmatprep.subr.mxu0 %v401_v38  ;;  %v514_v37 = vld [vmem:[%s2897_s1 + $0xf70] sm:$0xff]  ;;  %v311_v38 = vld [vmem:[%s2897_s1 + $0x918] sm:$0xff] }
  0x93   :  { %930 = vmatprep.subr.mxu1 %v467_v39  ;;  %882 = vmatpush2.msra.mxu0 %v400_v40  ;;  %v509_v39 = vld [vmem:[%s2897_s1 + $0xf48] sm:$0xff]  ;;  %v310_v40 = vld [vmem:[%s2897_s1 + $0x910] sm:$0xff] }
  0x94   :  { %931 = vmatpush1.msra.mxu1 %v466_v41  ;;  %883 = vmatprep.subr.mxu0 %v395_v42  ;;  %v508_v41 = vld [vmem:[%s2897_s1 + $0xf40] sm:$0xff]  ;;  %v503_v42 = vld [vmem:[%s2897_s1 + $0xf18] sm:$0xff] }
  0x95   :  { %932 = vmatprep.subr.mxu1 %v461_v43  ;;  %884 = vmatpush2.msra.mxu0 %v394_v44  ;;  %v115_v43 = vld [vmem:[%s2897_s1 + $0x2f8] sm:$0xff]  ;;  %v502_v44 = vld [vmem:[%s2897_s1 + $0xf10] sm:$0xff] }
  0x96   :  { %933 = vmatpush1.msra.mxu1 %v460_v45  ;;  %885 = vmatprep.subr.mxu0 %v389_v46  ;;  %v114_v45 = vld [vmem:[%s2897_s1 + $0x2f0] sm:$0xff]  ;;  %v109_v46 = vld [vmem:[%s2897_s1 + $0x2c8] sm:$0xff] }
  0x97   :  { %934 = vmatprep.subr.mxu1 %v455_v47  ;;  %886 = vmatpush2.msra.mxu0 %v388_v48  ;;  %v307_v47 = vld [vmem:[%s2897_s1 + $0x8f8] sm:$0xff] }
  0x98   :  { %935 = vmatpush1.msra.mxu1 %v454_v49  ;;  %887 = vmatprep.subr.mxu0 %v383_v50  ;;  %v103_v48 = vld [vmem:[%s2897_s1 + $0x298] sm:$0xff]  ;;  %v301_v49 = vld [vmem:[%s2897_s1 + $0x8c8] sm:$0xff]  ;;  %v300_v50 = vld [vmem:[%s2897_s1 + $0x8c0] sm:$0xff] }
  0x99   :  { %936 = vmatprep.subr.mxu1 %v449_v51  ;;  %888 = vmatpush2.msra.mxu0 %v382_v52  ;;  %v97_v51 = vld [vmem:[%s2897_s1 + $0x268] sm:$0xff]  ;;  %v96_v52 = vld [vmem:[%s2897_s1 + $0x260] sm:$0xff] }
  0x9a   :  { %937 = vmatpush1.msra.mxu1 %v448_v53  ;;  %889 = vmatprep.subr.mxu0 %v377_v54  ;;  %v294_v53 = vld [vmem:[%s2897_s1 + $0x890] sm:$0xff]  ;;  %v91_v54 = vld [vmem:[%s2897_s1 + $0x238] sm:$0xff] }
  0x9b   :  { %938 = vmatprep.subr.mxu1 %v443_v55  ;;  %890 = vmatpush2.msra.mxu0 %v376_v56  ;;  %v289_v55 = vld [vmem:[%s2897_s1 + $0x868] sm:$0xff]  ;;  %v90_v56 = vld [vmem:[%s2897_s1 + $0x230] sm:$0xff] }
  0x9c   :  { %939 = vmatpush1.msra.mxu1 %v442_v57  ;;  %891 = vmatprep.subr.mxu0 %v371_v58  ;;  %v288_v57 = vld [vmem:[%s2897_s1 + $0x860] sm:$0xff]  ;;  %v85_v58 = vld [vmem:[%s2897_s1 + $0x208] sm:$0xff] }
  0x9d   :  { %940 = vmatprep.subr.mxu1 %v437_v59  ;;  %892 = vmatpush2.msra.mxu0 %v370_v61  ;;  %v283_v59 = vld [vmem:[%s2897_s1 + $0x838] sm:$0xff]  ;;  %v84_v61 = vld [vmem:[%s2897_s1 + $0x200] sm:$0xff] }
  0x9e   :  { %941 = vmatpush1.msra.mxu1 %v436_v62  ;;  %893 = vmatprep.subr.mxu0 %v365_v0  ;;  %v282_v62 = vld [vmem:[%s2897_s1 + $0x830] sm:$0xff]  ;;  %v79_v0 = vld [vmem:[%s2897_s1 + $0x1d8] sm:$0xff] }
  0x9f   :  { %942 = vmatprep.subr.mxu1 %v431_v1  ;;  %894 = vmatpush2.msra.mxu0 %v364_v2  ;;  %v277_v1 = vld [vmem:[%s2897_s1 + $0x808] sm:$0xff]  ;;  %v78_v2 = vld [vmem:[%s2897_s1 + $0x1d0] sm:$0xff] }
  0xa0   :  { %943 = vmatpush1.msra.mxu1 %v430_v4  ;;  %895 = vmatprep.subr.mxu0 %v359_v6  ;;  %v276_v4 = vld [vmem:[%s2897_s1 + $0x800] sm:$0xff]  ;;  %v73_v6 = vld [vmem:[%s2897_s1 + $0x1a8] sm:$0xff] }
  0xa1   :  { %944 = vmatprep.subr.mxu1 %v425_v7  ;;  %896 = vmatpush2.msra.mxu0 %v358_v8  ;;  %v271_v7 = vld [vmem:[%s2897_s1 + $0x7d8] sm:$0xff]  ;;  %v72_v8 = vld [vmem:[%s2897_s1 + $0x1a0] sm:$0xff] }
  0xa2   :  { %945 = vmatpush1.msra.mxu1 %v424_v9  ;;  %897 = vmatprep.subr.mxu0 %v353_v10  ;;  %v270_v9 = vld [vmem:[%s2897_s1 + $0x7d0] sm:$0xff]  ;;  %v67_v10 = vld [vmem:[%s2897_s1 + $0x178] sm:$0xff] }
  0xa3   :  { %946 = vmatprep.subr.mxu1 %v419_v11  ;;  %898 = vmatpush2.msra.mxu0 %v352_v12  ;;  %v265_v11 = vld [vmem:[%s2897_s1 + $0x7a8] sm:$0xff]  ;;  %v66_v12 = vld [vmem:[%s2897_s1 + $0x170] sm:$0xff] }
  0xa4   :  { %947 = vmatpush1.msra.mxu1 %v418_v13  ;;  %899 = vmatprep.subr.mxu0 %v347_v14  ;;  %v264_v13 = vld [vmem:[%s2897_s1 + $0x7a0] sm:$0xff]  ;;  %v61_v14 = vld [vmem:[%s2897_s1 + $0x148] sm:$0xff] }
  0xa5   :  { %948 = vmatprep.subr.mxu1 %v413_v15  ;;  %900 = vmatpush2.msra.mxu0 %v346_v16  ;;  %v259_v15 = vld [vmem:[%s2897_s1 + $0x778] sm:$0xff]  ;;  %v60_v16 = vld [vmem:[%s2897_s1 + $0x140] sm:$0xff] }
  0xa6   :  { %949 = vmatpush1.msra.mxu1 %v412_v17  ;;  %901 = vmatprep.subr.mxu0 %v341_v18  ;;  %v258_v17 = vld [vmem:[%s2897_s1 + $0x770] sm:$0xff]  ;;  %v55_v18 = vld [vmem:[%s2897_s1 + $0x118] sm:$0xff] }
  0xa7   :  { %950 = vmatprep.subr.mxu1 %v407_v19  ;;  %902 = vmatpush2.msra.mxu0 %v340_v20  ;;  %v253_v19 = vld [vmem:[%s2897_s1 + $0x748] sm:$0xff]  ;;  %v54_v20 = vld [vmem:[%s2897_s1 + $0x110] sm:$0xff] }
  0xa8   :  { %951 = vmatpush1.msra.mxu1 %v406_v21  ;;  %903 = vmatprep.subr.mxu0 %v335_v60  ;;  %v252_v21 = vld [vmem:[%s2897_s1 + $0x740] sm:$0xff]  ;;  %v49_v60 = vld [vmem:[%s2897_s1 + $0xe8] sm:$0xff] }
  0xa9   :  { %1223 = vmatprep.subr.msk.mxu1 %vm546_vm0, %v533_v22  ;;  %904 = vmatpush2.msra.mxu0 %v334_v23  ;;  %v247_v22 = vld [vmem:[%s2897_s1 + $0x718] sm:$0xff]  ;;  %v48_v23 = vld [vmem:[%s2897_s1 + $0xe0] sm:$0xff] }
  0xaa   :  { %1224 = vmatpush2.msk.msra.mxu1 %vm546_vm0, %v532_v24  ;;  %905 = vmatprep.subr.mxu0 %v329_v63  ;;  %v246_v24 = vld [vmem:[%s2897_s1 + $0x710] sm:$0xff]  ;;  %v43_v63 = vld [vmem:[%s2897_s1 + $0xb8] sm:$0xff] }
  0xab   :  { %974 = vmatprep.subr.mxu1 %v527_v25  ;;  %906 = vmatpush2.msra.mxu0 %v328_v26  ;;  %v241_v25 = vld [vmem:[%s2897_s1 + $0x6e8] sm:$0xff]  ;;  %v42_v26 = vld [vmem:[%s2897_s1 + $0xb0] sm:$0xff] }
  0xac   :  { %975 = vmatpush2.msra.mxu1 %v526_v27  ;;  %907 = vmatprep.subr.mxu0 %v323_v28  ;;  %v240_v27 = vld [vmem:[%s2897_s1 + $0x6e0] sm:$0xff]  ;;  %v37_v28 = vld [vmem:[%s2897_s1 + $0x88] sm:$0xff] }
  0xad   :  { %976 = vmatprep.subr.mxu1 %v521_v30  ;;  %908 = vmatpush2.msra.mxu0 %v322_v32  ;;  %v235_v30 = vld [vmem:[%s2897_s1 + $0x6b8] sm:$0xff]  ;;  %v36_v32 = vld [vmem:[%s2897_s1 + $0x80] sm:$0xff] }
  0xae   :  { %977 = vmatpush2.msra.mxu1 %v520_v33  ;;  %909 = vmatprep.subr.mxu0 %v317_v34  ;;  %v234_v33 = vld [vmem:[%s2897_s1 + $0x6b0] sm:$0xff]  ;;  %v31_v34 = vld [vmem:[%s2897_s1 + $0x58] sm:$0xff] }
  0xaf   :  { %978 = vmatprep.subr.mxu1 %v515_v35  ;;  %910 = vmatpush2.msra.mxu0 %v316_v36  ;;  %v229_v35 = vld [vmem:[%s2897_s1 + $0x688] sm:$0xff]  ;;  %v30_v36 = vld [vmem:[%s2897_s1 + $0x50] sm:$0xff] }
  0xb0   :  { %979 = vmatpush2.msra.mxu1 %v514_v37  ;;  %911 = vmatprep.subr.mxu0 %v311_v38  ;;  %v228_v37 = vld [vmem:[%s2897_s1 + $0x680] sm:$0xff]  ;;  %v25_v38 = vld [vmem:[%s2897_s1 + $0x28] sm:$0xff] }
  0xb1   :  { %980 = vmatprep.subr.mxu1 %v509_v39  ;;  %912 = vmatpush2.msra.mxu0 %v310_v40  ;;  %v223_v39 = vld [vmem:[%s2897_s1 + $0x658] sm:$0xff]  ;;  %v24_v40 = vld [vmem:[%s2897_s1 + $0x20] sm:$0xff] }
  0xb2   :  { %913 = vmatprep.mubr.f32.mxu0 %v1659_v3  ;;  %981 = vmatpush2.msra.mxu1 %v508_v41  ;;  %v108_v3 = vld [vmem:[%s2897_s1 + $0x2c0] sm:$0xff]  ;;  %v222_v41 = vld [vmem:[%s2897_s1 + $0x650] sm:$0xff] }
  0xb3   :  { %914 = vmatmul.mubr.f32.vlgmr.msra.gmra.mxu0 %v1668_v5  ;;  %982 = vmatprep.subr.mxu1 %v503_v42  ;;  %v306_v5 = vld [vmem:[%s2897_s1 + $0x8f0] sm:$0xff]  ;;  %v211_v42 = vld [vmem:[%s2897_s1 + $0x5f8] sm:$0xff] }
  0xb4   :  { %991 = vmatprep.subr.mxu0 %v115_v43  ;;  %983 = vmatpush2.msra.mxu1 %v502_v44  ;;  %v217_v43 = vld [vmem:[%s2897_s1 + $0x628] sm:$0xff]  ;;  %v210_v44 = vld [vmem:[%s2897_s1 + $0x5f0] sm:$0xff] }
  0xb5   :  { %1225 = vmatprep.mubr.msk.f32.mxu1 %vm542_vm1, %v1926_v29  ;;  %992 = vmatpush1.msra.mxu0 %v114_v45  ;;  %v102_v29 = vld [vmem:[%s2897_s1 + $0x290] sm:$0xff]  ;;  %v216_v45 = vld [vmem:[%s2897_s1 + $0x620] sm:$0xff] }
  0xb6   :  { %985 = vmatmul.mubr.f32.vlgmr.msra.gmra.mxu1 %v1934_v31  ;;  %993 = vmatprep.subr.mxu0 %v109_v46  ;;  %v295_v31 = vld [vmem:[%s2897_s1 + $0x898] sm:$0xff]  ;;  %v205_v46 = vld [vmem:[%s2897_s1 + $0x5c8] sm:$0xff] }
  0xb7   :  { %1062 = vmatprep.subr.mxu1 %v307_v47  ;;  %994 = vmatpush1.msra.mxu0 %v108_v3  ;;  %v403_v47 = vld [vmem:[%s2897_s1 + $0xbf8] sm:$0xff]  ;;  %v204_v3 = vld [vmem:[%s2897_s1 + $0x5c0] sm:$0xff] }
  0xb8   :  { %1063 = vmatpush1.msra.mxu1 %v306_v5  ;;  %995 = vmatprep.subr.mxu0 %v103_v48  ;;  %v402_v5 = vld [vmem:[%s2897_s1 + $0xbf0] sm:$0xff]  ;;  %v199_v48 = vld [vmem:[%s2897_s1 + $0x598] sm:$0xff] }
  0xb9   :  { %1064 = vmatprep.subr.mxu1 %v301_v49  ;;  %996 = vmatpush1.msra.mxu0 %v102_v29  ;;  %v397_v49 = vld [vmem:[%s2897_s1 + $0xbc8] sm:$0xff]  ;;  %v198_v29 = vld [vmem:[%s2897_s1 + $0x590] sm:$0xff] }
  0xba   :  { %1065 = vmatpush1.msra.mxu1 %v300_v50  ;;  %997 = vmatprep.subr.mxu0 %v97_v51  ;;  %v396_v50 = vld [vmem:[%s2897_s1 + $0xbc0] sm:$0xff]  ;;  %v193_v51 = vld [vmem:[%s2897_s1 + $0x568] sm:$0xff] }
  0xbb   :  { %1066 = vmatprep.subr.mxu1 %v295_v31  ;;  %998 = vmatpush1.msra.mxu0 %v96_v52  ;;  %v391_v31 = vld [vmem:[%s2897_s1 + $0xb98] sm:$0xff]  ;;  %v192_v52 = vld [vmem:[%s2897_s1 + $0x560] sm:$0xff] }
  0xbc   :  { %1067 = vmatpush1.msra.mxu1 %v294_v53  ;;  %999 = vmatprep.subr.mxu0 %v91_v54  ;;  %v390_v53 = vld [vmem:[%s2897_s1 + $0xb90] sm:$0xff]  ;;  %v187_v54 = vld [vmem:[%s2897_s1 + $0x538] sm:$0xff] }
  0xbd   :  { %1068 = vmatprep.subr.mxu1 %v289_v55  ;;  %1000 = vmatpush1.msra.mxu0 %v90_v56  ;;  %v385_v55 = vld [vmem:[%s2897_s1 + $0xb68] sm:$0xff]  ;;  %v186_v56 = vld [vmem:[%s2897_s1 + $0x530] sm:$0xff] }
  0xbe   :  { %1069 = vmatpush1.msra.mxu1 %v288_v57  ;;  %1001 = vmatprep.subr.mxu0 %v85_v58  ;;  %v384_v57 = vld [vmem:[%s2897_s1 + $0xb60] sm:$0xff]  ;;  %v181_v58 = vld [vmem:[%s2897_s1 + $0x508] sm:$0xff] }
  0xbf   :  { %1070 = vmatprep.subr.mxu1 %v283_v59  ;;  %1002 = vmatpush1.msra.mxu0 %v84_v61  ;;  %v379_v59 = vld [vmem:[%s2897_s1 + $0xb38] sm:$0xff]  ;;  %v180_v61 = vld [vmem:[%s2897_s1 + $0x500] sm:$0xff] }
  0xc0   :  { %1071 = vmatpush1.msra.mxu1 %v282_v62  ;;  %1003 = vmatprep.subr.mxu0 %v79_v0  ;;  %v378_v62 = vld [vmem:[%s2897_s1 + $0xb30] sm:$0xff]  ;;  %v175_v0 = vld [vmem:[%s2897_s1 + $0x4d8] sm:$0xff] }
  0xc1   :  { %1072 = vmatprep.subr.mxu1 %v277_v1  ;;  %1004 = vmatpush1.msra.mxu0 %v78_v2  ;;  %v373_v1 = vld [vmem:[%s2897_s1 + $0xb08] sm:$0xff]  ;;  %v174_v2 = vld [vmem:[%s2897_s1 + $0x4d0] sm:$0xff] }
  0xc2   :  { %1073 = vmatpush1.msra.mxu1 %v276_v4  ;;  %1005 = vmatprep.subr.mxu0 %v73_v6  ;;  %v372_v4 = vld [vmem:[%s2897_s1 + $0xb00] sm:$0xff]  ;;  %v169_v6 = vld [vmem:[%s2897_s1 + $0x4a8] sm:$0xff] }
  0xc3   :  { %1074 = vmatprep.subr.mxu1 %v271_v7  ;;  %1006 = vmatpush1.msra.mxu0 %v72_v8  ;;  %v367_v7 = vld [vmem:[%s2897_s1 + $0xad8] sm:$0xff]  ;;  %v168_v8 = vld [vmem:[%s2897_s1 + $0x4a0] sm:$0xff] }
  0xc4   :  { %1075 = vmatpush1.msra.mxu1 %v270_v9  ;;  %1007 = vmatprep.subr.mxu0 %v67_v10  ;;  %v366_v9 = vld [vmem:[%s2897_s1 + $0xad0] sm:$0xff]  ;;  %v163_v10 = vld [vmem:[%s2897_s1 + $0x478] sm:$0xff] }
  0xc5   :  { %1076 = vmatprep.subr.mxu1 %v265_v11  ;;  %1008 = vmatpush1.msra.mxu0 %v66_v12  ;;  %v361_v11 = vld [vmem:[%s2897_s1 + $0xaa8] sm:$0xff]  ;;  %v162_v12 = vld [vmem:[%s2897_s1 + $0x470] sm:$0xff] }
  0xc6   :  { %1077 = vmatpush1.msra.mxu1 %v264_v13  ;;  %1009 = vmatprep.subr.mxu0 %v61_v14  ;;  %v360_v13 = vld [vmem:[%s2897_s1 + $0xaa0] sm:$0xff]  ;;  %v157_v14 = vld [vmem:[%s2897_s1 + $0x448] sm:$0xff] }
  0xc7   :  { %1078 = vmatprep.subr.mxu1 %v259_v15  ;;  %1010 = vmatpush1.msra.mxu0 %v60_v16  ;;  %v355_v15 = vld [vmem:[%s2897_s1 + $0xa78] sm:$0xff]  ;;  %v156_v16 = vld [vmem:[%s2897_s1 + $0x440] sm:$0xff] }
  0xc8   :  { %1079 = vmatpush1.msra.mxu1 %v258_v17  ;;  %1011 = vmatprep.subr.mxu0 %v55_v18  ;;  %v354_v17 = vld [vmem:[%s2897_s1 + $0xa70] sm:$0xff]  ;;  %v151_v18 = vld [vmem:[%s2897_s1 + $0x418] sm:$0xff] }
  0xc9   :  { %1080 = vmatprep.subr.mxu1 %v253_v19  ;;  %1012 = vmatpush1.msra.mxu0 %v54_v20  ;;  %v349_v19 = vld [vmem:[%s2897_s1 + $0xa48] sm:$0xff]  ;;  %v150_v20 = vld [vmem:[%s2897_s1 + $0x410] sm:$0xff] }
  0xca   :  { %1081 = vmatpush1.msra.mxu1 %v252_v21  ;;  %1013 = vmatprep.subr.mxu0 %v49_v60  ;;  %v348_v21 = vld [vmem:[%s2897_s1 + $0xa40] sm:$0xff]  ;;  %v145_v60 = vld [vmem:[%s2897_s1 + $0x3e8] sm:$0xff] }
  0xcb   :  { %1082 = vmatprep.subr.mxu1 %v247_v22  ;;  %1014 = vmatpush1.msra.mxu0 %v48_v23  ;;  %v343_v22 = vld [vmem:[%s2897_s1 + $0xa18] sm:$0xff]  ;;  %v144_v23 = vld [vmem:[%s2897_s1 + $0x3e0] sm:$0xff] }
  0xcc   :  { %1083 = vmatpush1.msra.mxu1 %v246_v24  ;;  %1015 = vmatprep.subr.mxu0 %v43_v63  ;;  %v342_v24 = vld [vmem:[%s2897_s1 + $0xa10] sm:$0xff]  ;;  %v139_v63 = vld [vmem:[%s2897_s1 + $0x3b8] sm:$0xff] }
  0xcd   :  { %1084 = vmatprep.subr.mxu1 %v241_v25  ;;  %1016 = vmatpush1.msra.mxu0 %v42_v26  ;;  %v337_v25 = vld [vmem:[%s2897_s1 + $0x9e8] sm:$0xff]  ;;  %v138_v26 = vld [vmem:[%s2897_s1 + $0x3b0] sm:$0xff] }
  0xce   :  { %1085 = vmatpush1.msra.mxu1 %v240_v27  ;;  %1017 = vmatprep.subr.mxu0 %v37_v28  ;;  %v336_v27 = vld [vmem:[%s2897_s1 + $0x9e0] sm:$0xff]  ;;  %v133_v28 = vld [vmem:[%s2897_s1 + $0x388] sm:$0xff] }
  0xcf   :  { %1086 = vmatprep.subr.mxu1 %v235_v30  ;;  %1018 = vmatpush1.msra.mxu0 %v36_v32  ;;  %v331_v30 = vld [vmem:[%s2897_s1 + $0x9b8] sm:$0xff]  ;;  %v132_v32 = vld [vmem:[%s2897_s1 + $0x380] sm:$0xff] }
  0xd0   :  { %1087 = vmatpush1.msra.mxu1 %v234_v33  ;;  %1019 = vmatprep.subr.mxu0 %v31_v34  ;;  %v330_v33 = vld [vmem:[%s2897_s1 + $0x9b0] sm:$0xff]  ;;  %v127_v34 = vld [vmem:[%s2897_s1 + $0x358] sm:$0xff] }
  0xd1   :  { %1088 = vmatprep.subr.mxu1 %v229_v35  ;;  %1020 = vmatpush1.msra.mxu0 %v30_v36  ;;  %v325_v35 = vld [vmem:[%s2897_s1 + $0x988] sm:$0xff]  ;;  %v126_v36 = vld [vmem:[%s2897_s1 + $0x350] sm:$0xff] }
  0xd2   :  { %1089 = vmatpush1.msra.mxu1 %v228_v37  ;;  %1021 = vmatprep.subr.mxu0 %v25_v38  ;;  %v324_v37 = vld [vmem:[%s2897_s1 + $0x980] sm:$0xff]  ;;  %v121_v38 = vld [vmem:[%s2897_s1 + $0x328] sm:$0xff] }
  0xd3   :  { %1090 = vmatprep.subr.mxu1 %v223_v39  ;;  %1022 = vmatpush1.msra.mxu0 %v24_v40  ;;  %v319_v39 = vld [vmem:[%s2897_s1 + $0x958] sm:$0xff]  ;;  %v120_v40 = vld [vmem:[%s2897_s1 + $0x320] sm:$0xff] }
  0xd4   :  { %1091 = vmatpush1.msra.mxu1 %v222_v41  ;;  %1023 = vmatprep.subr.mxu0 %v211_v42  ;;  %v318_v41 = vld [vmem:[%s2897_s1 + $0x950] sm:$0xff]  ;;  %v313_v42 = vld [vmem:[%s2897_s1 + $0x928] sm:$0xff] }
  0xd5   :  { %1092 = vmatprep.subr.mxu1 %v217_v43  ;;  %1024 = vmatpush2.msra.mxu0 %v210_v44  ;;  %v499_v43 = vld [vmem:[%s2897_s1 + $0xef8] sm:$0xff]  ;;  %v312_v44 = vld [vmem:[%s2897_s1 + $0x920] sm:$0xff] }
  0xd6   :  { %1093 = vmatpush1.msra.mxu1 %v216_v45  ;;  %1025 = vmatprep.subr.mxu0 %v205_v46  ;;  %v1231_v45 = vld [vmem:[%s2898_s0 + $0x8] sm:$0xff]  ;;  %v498_v46 = vld [vmem:[%s2897_s1 + $0xef0] sm:$0xff] }
  0xd7   :  { %1094 = vmatprep.subr.mxu1 %v403_v47  ;;  %1026 = vmatpush2.msra.mxu0 %v204_v3  ;;  %v1232_v47 = vld [vmem:[%s2898_s0] sm:$0xff]  ;;  %v493_v3 = vld [vmem:[%s2897_s1 + $0xec8] sm:$0xff] }
  0xd8   :  { %1095 = vmatpush2.msra.mxu1 %v402_v5  ;;  %1027 = vmatprep.subr.mxu0 %v199_v48  ;;  %v492_v5 = vld [vmem:[%s2897_s1 + $0xec0] sm:$0xff]  ;;  %v1233_v48 = vld [vmem:[%s2898_s0 + $0x18] sm:$0xff] }
  0xd9   :  { %1096 = vmatprep.subr.mxu1 %v397_v49  ;;  %1028 = vmatpush2.msra.mxu0 %v198_v29  ;;  %v487_v49 = vld [vmem:[%s2897_s1 + $0xe98] sm:$0xff]  ;;  %v1234_v29 = vld [vmem:[%s2898_s0 + $0x10] sm:$0xff] }
  0xda   :  { %1097 = vmatpush2.msra.mxu1 %v396_v50  ;;  %1029 = vmatprep.subr.mxu0 %v193_v51  ;;  %v486_v50 = vld [vmem:[%s2897_s1 + $0xe90] sm:$0xff]  ;;  %v481_v51 = vld [vmem:[%s2897_s1 + $0xe68] sm:$0xff] }
  0xdb   :  { %1098 = vmatprep.subr.mxu1 %v391_v31  ;;  %1030 = vmatpush2.msra.mxu0 %v192_v52  ;;  %v1235_v31 = vld [vmem:[%s2898_s0 + $0x28] sm:$0xff]  ;;  %v480_v52 = vld [vmem:[%s2897_s1 + $0xe60] sm:$0xff] }
  0xdc   :  { %1099 = vmatpush2.msra.mxu1 %v390_v53  ;;  %1031 = vmatprep.subr.mxu0 %v187_v54  ;;  %v475_v53 = vld [vmem:[%s2897_s1 + $0xe38] sm:$0xff]  ;;  %v474_v54 = vld [vmem:[%s2897_s1 + $0xe30] sm:$0xff] }
  0xdd   :  { %1100 = vmatprep.subr.mxu1 %v385_v55  ;;  %1032 = vmatpush2.msra.mxu0 %v186_v56  ;;  %v469_v55 = vld [vmem:[%s2897_s1 + $0xe08] sm:$0xff]  ;;  %v468_v56 = vld [vmem:[%s2897_s1 + $0xe00] sm:$0xff] }
  0xde   :  { %1101 = vmatpush2.msra.mxu1 %v384_v57  ;;  %1033 = vmatprep.subr.mxu0 %v181_v58  ;;  %v463_v57 = vld [vmem:[%s2897_s1 + $0xdd8] sm:$0xff]  ;;  %v462_v58 = vld [vmem:[%s2897_s1 + $0xdd0] sm:$0xff] }
  0xdf   :  { %1102 = vmatprep.subr.mxu1 %v379_v59  ;;  %1034 = vmatpush2.msra.mxu0 %v180_v61  ;;  %v457_v59 = vld [vmem:[%s2897_s1 + $0xda8] sm:$0xff]  ;;  %v456_v61 = vld [vmem:[%s2897_s1 + $0xda0] sm:$0xff] }
  0xe0   :  { %1103 = vmatpush2.msra.mxu1 %v378_v62  ;;  %1035 = vmatprep.subr.mxu0 %v175_v0  ;;  %v451_v62 = vld [vmem:[%s2897_s1 + $0xd78] sm:$0xff]  ;;  %v450_v0 = vld [vmem:[%s2897_s1 + $0xd70] sm:$0xff] }
  0xe1   :  { %1104 = vmatprep.subr.mxu1 %v373_v1  ;;  %1036 = vmatpush2.msra.mxu0 %v174_v2  ;;  %v445_v1 = vld [vmem:[%s2897_s1 + $0xd48] sm:$0xff]  ;;  %v444_v2 = vld [vmem:[%s2897_s1 + $0xd40] sm:$0xff] }
  0xe2   :  { %1105 = vmatpush2.msra.mxu1 %v372_v4  ;;  %1037 = vmatprep.subr.mxu0 %v169_v6  ;;  %v439_v4 = vld [vmem:[%s2897_s1 + $0xd18] sm:$0xff]  ;;  %v438_v6 = vld [vmem:[%s2897_s1 + $0xd10] sm:$0xff] }
  0xe3   :  { %1106 = vmatprep.subr.mxu1 %v367_v7  ;;  %1038 = vmatpush2.msra.mxu0 %v168_v8  ;;  %v433_v7 = vld [vmem:[%s2897_s1 + $0xce8] sm:$0xff]  ;;  %v432_v8 = vld [vmem:[%s2897_s1 + $0xce0] sm:$0xff] }
  0xe4   :  { %1107 = vmatpush2.msra.mxu1 %v366_v9  ;;  %1039 = vmatprep.subr.mxu0 %v163_v10  ;;  %v427_v9 = vld [vmem:[%s2897_s1 + $0xcb8] sm:$0xff]  ;;  %v426_v10 = vld [vmem:[%s2897_s1 + $0xcb0] sm:$0xff] }
  0xe5   :  { %1108 = vmatprep.subr.mxu1 %v361_v11  ;;  %1040 = vmatpush2.msra.mxu0 %v162_v12  ;;  %v421_v11 = vld [vmem:[%s2897_s1 + $0xc88] sm:$0xff]  ;;  %v420_v12 = vld [vmem:[%s2897_s1 + $0xc80] sm:$0xff] }
  0xe6   :  { %1109 = vmatpush2.msra.mxu1 %v360_v13  ;;  %1041 = vmatprep.subr.mxu0 %v157_v14  ;;  %v415_v13 = vld [vmem:[%s2897_s1 + $0xc58] sm:$0xff]  ;;  %v414_v14 = vld [vmem:[%s2897_s1 + $0xc50] sm:$0xff] }
  0xe7   :  { %1110 = vmatprep.subr.mxu1 %v355_v15  ;;  %1042 = vmatpush2.msra.mxu0 %v156_v16  ;;  %v409_v15 = vld [vmem:[%s2897_s1 + $0xc28] sm:$0xff]  ;;  %v408_v16 = vld [vmem:[%s2897_s1 + $0xc20] sm:$0xff] }
  0xe8   :  { %1111 = vmatpush2.msra.mxu1 %v354_v17  ;;  %1043 = vmatprep.subr.mxu0 %v151_v18  ;;  %v535_v17 = vld [vmem:[%s2897_s1 + $0x1018] sm:$0x3f]  ;;  %v534_v18 = vld [vmem:[%s2897_s1 + $0x1010] sm:$0x3f] }
  0xe9   :  { %1112 = vmatprep.subr.mxu1 %v349_v19  ;;  %1044 = vmatpush2.msra.mxu0 %v150_v20  ;;  %v529_v19 = vld [vmem:[%s2897_s1 + $0xfe8] sm:$0xff]  ;;  %v528_v20 = vld [vmem:[%s2897_s1 + $0xfe0] sm:$0xff] }
  0xea   :  { %1113 = vmatpush2.msra.mxu1 %v348_v21  ;;  %1045 = vmatprep.subr.mxu0 %v145_v60  ;;  %v523_v21 = vld [vmem:[%s2897_s1 + $0xfb8] sm:$0xff]  ;;  %v522_v60 = vld [vmem:[%s2897_s1 + $0xfb0] sm:$0xff] }
  0xeb   :  { %1114 = vmatprep.subr.mxu1 %v343_v22  ;;  %1046 = vmatpush2.msra.mxu0 %v144_v23  ;;  %v517_v22 = vld [vmem:[%s2897_s1 + $0xf88] sm:$0xff]  ;;  %v516_v23 = vld [vmem:[%s2897_s1 + $0xf80] sm:$0xff] }
  0xec   :  { %1115 = vmatpush2.msra.mxu1 %v342_v24  ;;  %1047 = vmatprep.subr.mxu0 %v139_v63  ;;  %v511_v24 = vld [vmem:[%s2897_s1 + $0xf58] sm:$0xff]  ;;  %v510_v63 = vld [vmem:[%s2897_s1 + $0xf50] sm:$0xff] }
  0xed   :  { %1116 = vmatprep.subr.mxu1 %v337_v25  ;;  %1048 = vmatpush2.msra.mxu0 %v138_v26  ;;  %v505_v25 = vld [vmem:[%s2897_s1 + $0xf28] sm:$0xff]  ;;  %v504_v26 = vld [vmem:[%s2897_s1 + $0xf20] sm:$0xff] }
  0xee   :  { %1117 = vmatpush2.msra.mxu1 %v336_v27  ;;  %1049 = vmatprep.subr.mxu0 %v133_v28  ;;  %v1236_v27 = vld [vmem:[%s2898_s0 + $0x20] sm:$0xff] }
  0xef   :  { %1118 = vmatprep.subr.mxu1 %v331_v30  ;;  %1050 = vmatpush2.msra.mxu0 %v132_v32 }
  0xf0   :  { %1119 = vmatpush2.msra.mxu1 %v330_v33  ;;  %1051 = vmatprep.subr.mxu0 %v127_v34 }
  0xf1   :  { %1120 = vmatprep.subr.mxu1 %v325_v35  ;;  %1052 = vmatpush2.msra.mxu0 %v126_v36 }
  0xf2   :  { %1121 = vmatpush2.msra.mxu1 %v324_v37  ;;  %1053 = vmatprep.subr.mxu0 %v121_v38 }
  0xf3   :  { %1122 = vmatprep.subr.mxu1 %v319_v39  ;;  %1054 = vmatpush2.msra.mxu0 %v120_v40 }
  0xf4   :  { %1055 = vmatprep.mubr.f32.mxu0 %v1231_v45  ;;  %1123 = vmatpush2.msra.mxu1 %v318_v41 }
  0xf5   :  { %1056 = vmatmul.mubr.f32.vlgmr.msra.gmra.mxu0 %v1232_v47  ;;  %1124 = vmatprep.subr.mxu1 %v313_v42 }
  0xf6   :  { %1133 = vmatprep.subr.mxu0 %v499_v43  ;;  %1125 = vmatpush2.msra.mxu1 %v312_v44 }
  0xf7   :  { %1126 = vmatprep.mubr.f32.mxu1 %v1233_v48  ;;  %1134 = vmatpush1.msra.mxu0 %v498_v46 }
  0xf8   :  { %1127 = vmatmul.mubr.f32.vlgmr.msra.gmra.mxu1 %v1234_v29  ;;  %1135 = vmatprep.subr.mxu0 %v493_v3 }
  0xf9   :  { %1136 = vmatpush1.msra.mxu0 %v492_v5  ;;  %1228 = vmatprep.mubr.msk.f32.mxu0 %vm542_vm1, %v1235_v31 }
  0xfa   :  { %1137 = vmatprep.subr.mxu0 %v487_v49 }
  0xfb   :  { %1138 = vmatpush1.msra.mxu0 %v486_v50 }
  0xfc   :  { %1139 = vmatprep.subr.mxu0 %v481_v51 }
  0xfd   :  { %1140 = vmatpush1.msra.mxu0 %v480_v52 }
  0xfe   :  { %1141 = vmatprep.subr.mxu0 %v475_v53 }
  0xff   :  { %1142 = vmatpush1.msra.mxu0 %v474_v54 }
 0x100   :  { %1143 = vmatprep.subr.mxu0 %v469_v55 }
 0x101   :  { %1144 = vmatpush1.msra.mxu0 %v468_v56 }
 0x102   :  { %1145 = vmatprep.subr.mxu0 %v463_v57  ;;  %v631_v28 = vpop.f32.mrf.mxu0 }
 0x103   :  { %1146 = vmatpush1.msra.mxu0 %v462_v58 }
 0x104   :  { %1147 = vmatprep.subr.mxu0 %v457_v59  ;;  %v633_v32 = vpop.f32.mrf.mxu0 }
 0x105   :  { %1148 = vmatpush1.msra.mxu0 %v456_v61  ;;  %v702_v33 = vpop.f32.mrf.mxu1 }
 0x106   :  { %1149 = vmatprep.subr.mxu0 %v451_v62 }
 0x107   :  { %1150 = vmatpush1.msra.mxu0 %v450_v0  ;;  %v540_v30 = vpop.permute.xlu0 %539  ;;  %v704_v36 = vpop.f32.mrf.mxu1 }
 0x108   :  { %1151 = vmatprep.subr.mxu0 %v445_v1  ;;  %v632_v34 = vadd.f32 %v631_v28, %v540_v30  ;;  %v634_v35 = vadd.f32 %v633_v32, %v540_v30 }
 0x109   :  { %1152 = vmatpush1.msra.mxu0 %v444_v2 }
 0x10a   :  { %1153 = vmatprep.subr.mxu0 %v439_v4  ;;  %v703_v37 = vadd.f32 %v702_v33, %v632_v34  ;;  %v705_v39 = vadd.f32 %v704_v36, %v634_v35 }
 0x10b   :  { %1154 = vmatpush1.msra.mxu0 %v438_v6 }
 0x10c   :  { %1155 = vmatprep.subr.mxu0 %v433_v7 }
 0x10d   :  { %1156 = vmatpush1.msra.mxu0 %v432_v8 }
 0x10e   :  { %1157 = vmatprep.subr.mxu0 %v427_v9 }
 0x10f   :  { %1158 = vmatpush1.msra.mxu0 %v426_v10 }
 0x110   :  { %1159 = vmatprep.subr.mxu0 %v421_v11 }
 0x111   :  { %1160 = vmatpush1.msra.mxu0 %v420_v12 }
 0x112   :  { %1161 = vmatprep.subr.mxu0 %v415_v13 }
 0x113   :  { %1162 = vmatpush1.msra.mxu0 %v414_v14 }
 0x114   :  { %1163 = vmatprep.subr.mxu0 %v409_v15 }
 0x115   :  { %1164 = vmatpush1.msra.mxu0 %v408_v16 }
 0x116   :  { %1226 = vmatprep.subr.msk.mxu0 %vm546_vm0, %v535_v17 }
 0x117   :  { %1227 = vmatpush2.msk.msra.mxu0 %vm546_vm0, %v534_v18 }
 0x118   :  { %1187 = vmatprep.subr.mxu0 %v529_v19 }
 0x119   :  { %1188 = vmatpush2.msra.mxu0 %v528_v20 }
 0x11a   :  { %1189 = vmatprep.subr.mxu0 %v523_v21 }
 0x11b   :  { %1190 = vmatpush2.msra.mxu0 %v522_v60 }
 0x11c   :  { %1191 = vmatprep.subr.mxu0 %v517_v22 }
 0x11d   :  { %1192 = vmatpush2.msra.mxu0 %v516_v23 }
 0x11e   :  { %1193 = vmatprep.subr.mxu0 %v511_v24 }
 0x11f   :  { %1194 = vmatpush2.msra.mxu0 %v510_v63 }
 0x120   :  { %1195 = vmatprep.subr.mxu0 %v505_v25 }
 0x121   :  { %1196 = vmatpush2.msra.mxu0 %v504_v26 }
 0x122   :  { %1198 = vmatmul.mubr.f32.vlgmr.msra.gmra.mxu0 %v1236_v27 }
 0x130   :  { %v773_v38 = vpop.f32.mrf.mxu0 }
 0x131   :  { %v774_v40 = vadd.f32 %v773_v38, %v703_v37 }
 0x132   :  { %v775_v41 = vpop.f32.mrf.mxu0 }
 0x133   :  { %v1204_v42 = vmax.f32 %v774_v40, 0.0  ;;  %v776_v43 = vadd.f32 %v775_v41, %v705_v39 }
 0x135   :  { %1210 = vst [vmem:[%s2900_s3] sm:$0xff] %v1204_v42  ;;  %v1205_v44 = vmax.f32 %v776_v43, 0.0 }
 0x137   :  { %1211 = vst [vmem:[%s2900_s3 + $0x8] sm:$0xff] %v1205_v44 }
 0x148   :  { %v844_v45 = vpop.f32.mrf.mxu1 }
 0x149   :  { %v845_v47 = vadd.f32 %v844_v45, %v540_v30 }
 0x14a   :  { %v846_v46 = vpop.f32.mrf.mxu1 }
 0x14b   :  { %v847_v3 = vadd.f32 %v846_v46, %v540_v30 }
 0x173   :  { %v915_v5 = vpop.f32.mrf.mxu0 }
 0x174   :  { %v916_v48 = vadd.f32 %v915_v5, %v845_v47 }
 0x175   :  { %v917_v49 = vpop.f32.mrf.mxu0 }
 0x176   :  { %v918_v29 = vadd.f32 %v917_v49, %v847_v3  ;;  %v986_v50 = vpop.f32.mrf.mxu1 }
 0x177   :  { %v987_v51 = vadd.f32 %v986_v50, %v916_v48 }
 0x178   :  { %v988_v31 = vpop.f32.mrf.mxu1 }
 0x179   :  { %v1206_v52 = vmax.f32 %v987_v51, 0.0  ;;  %v989_v53 = vadd.f32 %v988_v31, %v918_v29 }
 0x17b   :  { %1212 = vst [vmem:[%s2900_s3 + $0x10] sm:$0xff] %v1206_v52  ;;  %v1207_v54 = vmax.f32 %v989_v53, 0.0 }
 0x17d   :  { %1213 = vst [vmem:[%s2900_s3 + $0x18] sm:$0xff] %v1207_v54 }
 0x1b5   :  { %v1057_v55 = vpop.f32.mrf.mxu0 }
 0x1b6   :  { %v1058_v58 = vadd.f32 %v1057_v55, %v540_v30 }
 0x1b7   :  { %v1059_v56 = vpop.f32.mrf.mxu0 }
 0x1b8   :  { %v1128_v57 = vpop.f32.mrf.mxu1  ;;  %v1060_v59 = vadd.f32 %v1059_v56, %v540_v30 }
 0x1b9   :  { %v1129_v62 = vadd.f32 %v1128_v57, %v1058_v58 }
 0x1ba   :  { %v1130_v61 = vpop.f32.mrf.mxu1 }
 0x1bb   :  { %v1131_v1 = vadd.f32 %v1130_v61, %v1060_v59 }
 0x1e2   :  { %v1199_v0 = vpop.f32.mrf.mxu0 }
 0x1e3   :  { %v1200_v2 = vadd.f32 %v1199_v0, %v1129_v62 }
 0x1e4   :  { %v1201_v4 = vpop.f32.mrf.mxu0 }
 0x1e5   :  { %v1208_v6 = vmax.f32 %v1200_v2, 0.0  ;;  %v1202_v7 = vadd.f32 %v1201_v4, %v1131_v1 }
 0x1e7   :  { %1214 = vst [vmem:[%s2900_s3 + $0x20] sm:$0xff] %v1208_v6  ;;  %v1209_v8 = vmax.f32 %v1202_v7, 0.0 }
 0x1e9   :  { %1215 = vst.msk [vmem:[%s2900_s3 + $0x28] sm:$0xff] %vm542_vm1, %v1209_v8 }

// kernel: forward.6
= control target key start
LH: loop header
LB: loop body
LE: loop exit
PB: predicated region body
PF: predicated region fallthrough
CT: control target
= control target key end

     0   :  { %v423_v3 = vmov 0   ;;  %vm184_vm0 = vcmask 719872   ;;  %vm412_vm1 = vcmask 375808   ;;  %s970_s1 = inlined_call_operand.vmem [shape: f32[216,686], index: 1, kind: input, shape index: {}]   ;;  %s971_s0 = inlined_call_operand.vmem [shape: f32[8,216], index: 0, kind: input, shape index: {}]   ;;  %s972_s2 = inlined_call_operand.vmem [shape: f32[8,1], index: 2, kind: input, shape index: {}]   ;;  %s973_s3 = inlined_call_operand.vmem [shape: f32[8,686], index: 3, kind: output, shape index: {}]  }
   0x1   :  { %v107_v0 = vld [vmem:[%s970_s1 + $0x2d8] sm:$0xff]  ;;  %v106_v1 = vld [vmem:[%s970_s1 + $0x2d0] sm:$0xff]  ;;  %v101_v2 = vld [vmem:[%s970_s1 + $0x2a8] sm:$0xff]  ;;  %422 = vset.pattern.permute.xlu0 %v423_v3 }
   0x2   :  { %188 = vmatprep.subr.mxu0 %v107_v0  ;;  %v100_v4 = vld [vmem:[%s970_s1 + $0x2a0] sm:$0xff]  ;;  %v95_v5 = vld [vmem:[%s970_s1 + $0x278] sm:$0xff]  ;;  %v94_v6 = vld [vmem:[%s970_s1 + $0x270] sm:$0xff] }
   0x3   :  { %189 = vmatpush1.msra.mxu0 %v106_v1  ;;  %v89_v7 = vld [vmem:[%s970_s1 + $0x248] sm:$0xff]  ;;  %v88_v8 = vld [vmem:[%s970_s1 + $0x240] sm:$0xff]  ;;  %v83_v9 = vld [vmem:[%s970_s1 + $0x218] sm:$0xff] }
   0x4   :  { %190 = vmatprep.subr.mxu0 %v101_v2  ;;  %v82_v10 = vld [vmem:[%s970_s1 + $0x210] sm:$0xff]  ;;  %v77_v11 = vld [vmem:[%s970_s1 + $0x1e8] sm:$0xff]  ;;  %v76_v12 = vld [vmem:[%s970_s1 + $0x1e0] sm:$0xff] }
   0x5   :  { %191 = vmatpush1.msra.mxu0 %v100_v4  ;;  %v71_v13 = vld [vmem:[%s970_s1 + $0x1b8] sm:$0xff]  ;;  %v70_v14 = vld [vmem:[%s970_s1 + $0x1b0] sm:$0xff]  ;;  %v65_v15 = vld [vmem:[%s970_s1 + $0x188] sm:$0xff] }
   0x6   :  { %192 = vmatprep.subr.mxu0 %v95_v5  ;;  %v64_v16 = vld [vmem:[%s970_s1 + $0x180] sm:$0xff]  ;;  %v59_v17 = vld [vmem:[%s970_s1 + $0x158] sm:$0xff]  ;;  %v58_v18 = vld [vmem:[%s970_s1 + $0x150] sm:$0xff] }
   0x7   :  { %193 = vmatpush1.msra.mxu0 %v94_v6  ;;  %v53_v19 = vld [vmem:[%s970_s1 + $0x128] sm:$0xff]  ;;  %v52_v20 = vld [vmem:[%s970_s1 + $0x120] sm:$0xff]  ;;  %v47_v22 = vld [vmem:[%s970_s1 + $0xf8] sm:$0xff] }
   0x8   :  { %194 = vmatprep.subr.mxu0 %v89_v7  ;;  %v109_v21 = vld [vmem:[%s970_s1 + $0x2e8] sm:$0xff]  ;;  %v108_v24 = vld [vmem:[%s970_s1 + $0x2e0] sm:$0xff]  ;;  %v46_v25 = vld [vmem:[%s970_s1 + $0xf0] sm:$0xff] }
   0x9   :  { %195 = vmatpush1.msra.mxu0 %v88_v8  ;;  %259 = vmatprep.subr.mxu1 %v109_v21  ;;  %v513_v23 = vld [vmem:[%s971_s0 + $0x8] sm:$0xff]  ;;  %v103_v26 = vld [vmem:[%s970_s1 + $0x2b8] sm:$0xff]  ;;  %v102_v28 = vld [vmem:[%s970_s1 + $0x2b0] sm:$0xff] }
   0xa   :  { %196 = vmatprep.subr.mxu0 %v83_v9  ;;  %418 = vmatprep.mubr.msk.f32.mxu0 %vm184_vm0, %v513_v23  ;;  %v41_v27 = vld [vmem:[%s970_s1 + $0xc8] sm:$0xff]  ;;  %v40_v30 = vld [vmem:[%s970_s1 + $0xc0] sm:$0xff]  ;;  %v35_v32 = vld [vmem:[%s970_s1 + $0x98] sm:$0xff] }
   0xb   :  { %197 = vmatpush1.msra.mxu0 %v82_v10  ;;  %260 = vmatpush1.msra.mxu1 %v108_v24  ;;  %v97_v29 = vld [vmem:[%s970_s1 + $0x288] sm:$0xff]  ;;  %v96_v31 = vld [vmem:[%s970_s1 + $0x280] sm:$0xff]  ;;  %v91_v33 = vld [vmem:[%s970_s1 + $0x258] sm:$0xff] }
   0xc   :  { %198 = vmatprep.subr.mxu0 %v77_v11  ;;  %261 = vmatprep.subr.mxu1 %v103_v26  ;;  %v34_v34 = vld [vmem:[%s970_s1 + $0x90] sm:$0xff]  ;;  %v29_v36 = vld [vmem:[%s970_s1 + $0x68] sm:$0xff]  ;;  %v28_v38 = vld [vmem:[%s970_s1 + $0x60] sm:$0xff] }
   0xd   :  { %199 = vmatpush1.msra.mxu0 %v76_v12  ;;  %262 = vmatpush1.msra.mxu1 %v102_v28  ;;  %v90_v35 = vld [vmem:[%s970_s1 + $0x250] sm:$0xff]  ;;  %v85_v37 = vld [vmem:[%s970_s1 + $0x228] sm:$0xff]  ;;  %v84_v39 = vld [vmem:[%s970_s1 + $0x220] sm:$0xff] }
   0xe   :  { %200 = vmatprep.subr.mxu0 %v71_v13  ;;  %263 = vmatprep.subr.mxu1 %v97_v29  ;;  %v23_v40 = vld [vmem:[%s970_s1 + $0x38] sm:$0xff]  ;;  %v22_v42 = vld [vmem:[%s970_s1 + $0x30] sm:$0xff]  ;;  %v17_v44 = vld [vmem:[%s970_s1 + $0x8] sm:$0xff] }
   0xf   :  { %201 = vmatpush1.msra.mxu0 %v70_v14  ;;  %264 = vmatpush1.msra.mxu1 %v96_v31  ;;  %v79_v41 = vld [vmem:[%s970_s1 + $0x1f8] sm:$0xff]  ;;  %v78_v43 = vld [vmem:[%s970_s1 + $0x1f0] sm:$0xff]  ;;  %v73_v45 = vld [vmem:[%s970_s1 + $0x1c8] sm:$0xff] }
  0x10   :  { %202 = vmatprep.subr.mxu0 %v65_v15  ;;  %265 = vmatprep.subr.mxu1 %v91_v33  ;;  %v16_v46 = vld [vmem:[%s970_s1] sm:$0xff]  ;;  %v173_v48 = vld [vmem:[%s970_s1 + $0x4e8] sm:$0xff]  ;;  %v67_v49 = vld [vmem:[%s970_s1 + $0x198] sm:$0xff] }
  0x11   :  { %203 = vmatpush1.msra.mxu0 %v64_v16  ;;  %266 = vmatpush1.msra.mxu1 %v90_v35  ;;  %v72_v47 = vld [vmem:[%s970_s1 + $0x1c0] sm:$0xff]  ;;  %v66_v51 = vld [vmem:[%s970_s1 + $0x190] sm:$0xff]  ;;  %v167_v52 = vld [vmem:[%s970_s1 + $0x4b8] sm:$0xff] }
  0x12   :  { %204 = vmatprep.subr.mxu0 %v59_v17  ;;  %267 = vmatprep.subr.mxu1 %v85_v37  ;;  %v172_v50 = vld [vmem:[%s970_s1 + $0x4e0] sm:$0xff]  ;;  %v61_v53 = vld [vmem:[%s970_s1 + $0x168] sm:$0xff]  ;;  %v166_v54 = vld [vmem:[%s970_s1 + $0x4b0] sm:$0xff] }
  0x13   :  { %205 = vmatpush1.msra.mxu0 %v58_v18  ;;  %268 = vmatpush1.msra.mxu1 %v84_v39  ;;  %v60_v55 = vld [vmem:[%s970_s1 + $0x160] sm:$0xff]  ;;  %v161_v56 = vld [vmem:[%s970_s1 + $0x488] sm:$0xff]  ;;  %v55_v57 = vld [vmem:[%s970_s1 + $0x138] sm:$0xff] }
  0x14   :  { %206 = vmatprep.subr.mxu0 %v53_v19  ;;  %269 = vmatprep.subr.mxu1 %v79_v41  ;;  %v160_v58 = vld [vmem:[%s970_s1 + $0x480] sm:$0xff]  ;;  %v54_v59 = vld [vmem:[%s970_s1 + $0x130] sm:$0xff]  ;;  %v155_v60 = vld [vmem:[%s970_s1 + $0x458] sm:$0xff] }
  0x15   :  { %207 = vmatpush1.msra.mxu0 %v52_v20  ;;  %270 = vmatpush1.msra.mxu1 %v78_v43  ;;  %v49_v61 = vld [vmem:[%s970_s1 + $0x108] sm:$0xff]  ;;  %v154_v62 = vld [vmem:[%s970_s1 + $0x450] sm:$0xff]  ;;  %v48_v63 = vld [vmem:[%s970_s1 + $0x100] sm:$0xff] }
  0x16   :  { %208 = vmatprep.subr.mxu0 %v47_v22  ;;  %271 = vmatprep.subr.mxu1 %v73_v45  ;;  %v149_v0 = vld [vmem:[%s970_s1 + $0x428] sm:$0xff]  ;;  %v43_v1 = vld [vmem:[%s970_s1 + $0xd8] sm:$0xff]  ;;  %v148_v2 = vld [vmem:[%s970_s1 + $0x420] sm:$0xff] }
  0x17   :  { %209 = vmatpush1.msra.mxu0 %v46_v25  ;;  %272 = vmatpush1.msra.mxu1 %v72_v47  ;;  %v42_v3 = vld [vmem:[%s970_s1 + $0xd0] sm:$0xff]  ;;  %v143_v4 = vld [vmem:[%s970_s1 + $0x3f8] sm:$0xff]  ;;  %v37_v5 = vld [vmem:[%s970_s1 + $0xa8] sm:$0xff] }
  0x18   :  { %210 = vmatprep.subr.mxu0 %v41_v27  ;;  %273 = vmatprep.subr.mxu1 %v67_v49  ;;  %v142_v6 = vld [vmem:[%s970_s1 + $0x3f0] sm:$0xff]  ;;  %v36_v7 = vld [vmem:[%s970_s1 + $0xa0] sm:$0xff]  ;;  %v137_v8 = vld [vmem:[%s970_s1 + $0x3c8] sm:$0xff] }
  0x19   :  { %211 = vmatpush1.msra.mxu0 %v40_v30  ;;  %274 = vmatpush1.msra.mxu1 %v66_v51  ;;  %v31_v9 = vld [vmem:[%s970_s1 + $0x78] sm:$0xff]  ;;  %v136_v10 = vld [vmem:[%s970_s1 + $0x3c0] sm:$0xff]  ;;  %v30_v11 = vld [vmem:[%s970_s1 + $0x70] sm:$0xff] }
  0x1a   :  { %212 = vmatprep.subr.mxu0 %v35_v32  ;;  %275 = vmatprep.subr.mxu1 %v61_v53  ;;  %v131_v12 = vld [vmem:[%s970_s1 + $0x398] sm:$0xff]  ;;  %v25_v13 = vld [vmem:[%s970_s1 + $0x48] sm:$0xff]  ;;  %v130_v14 = vld [vmem:[%s970_s1 + $0x390] sm:$0xff] }
  0x1b   :  { %213 = vmatpush1.msra.mxu0 %v34_v34  ;;  %276 = vmatpush1.msra.mxu1 %v60_v55  ;;  %v24_v15 = vld [vmem:[%s970_s1 + $0x40] sm:$0xff]  ;;  %v125_v16 = vld [vmem:[%s970_s1 + $0x368] sm:$0xff]  ;;  %v19_v17 = vld [vmem:[%s970_s1 + $0x18] sm:$0xff] }
  0x1c   :  { %214 = vmatprep.subr.mxu0 %v29_v36  ;;  %277 = vmatprep.subr.mxu1 %v55_v57  ;;  %v124_v18 = vld [vmem:[%s970_s1 + $0x360] sm:$0xff]  ;;  %v18_v19 = vld [vmem:[%s970_s1 + $0x10] sm:$0xff]  ;;  %v119_v20 = vld [vmem:[%s970_s1 + $0x338] sm:$0xff] }
  0x1d   :  { %215 = vmatpush1.msra.mxu0 %v28_v38  ;;  %278 = vmatpush1.msra.mxu1 %v54_v59  ;;  %v175_v21 = vld [vmem:[%s970_s1 + $0x4f8] sm:$0xff]  ;;  %v118_v22 = vld [vmem:[%s970_s1 + $0x330] sm:$0xff]  ;;  %v113_v25 = vld [vmem:[%s970_s1 + $0x308] sm:$0xff] }
  0x1e   :  { %216 = vmatprep.subr.mxu0 %v23_v40  ;;  %279 = vmatprep.subr.mxu1 %v49_v61  ;;  %v174_v24 = vld [vmem:[%s970_s1 + $0x4f0] sm:$0xff]  ;;  %v169_v26 = vld [vmem:[%s970_s1 + $0x4c8] sm:$0xff]  ;;  %v112_v27 = vld [vmem:[%s970_s1 + $0x300] sm:$0xff] }
  0x1f   :  { %217 = vmatpush1.msra.mxu0 %v22_v42  ;;  %280 = vmatpush1.msra.mxu1 %v48_v63  ;;  %v168_v28 = vld [vmem:[%s970_s1 + $0x4c0] sm:$0xff]  ;;  %v111_v30 = vld [vmem:[%s970_s1 + $0x2f8] sm:$0xff]  ;;  %v110_v31 = vld [vmem:[%s970_s1 + $0x2f0] sm:$0xff] }
  0x20   :  { %218 = vmatprep.subr.mxu0 %v17_v44  ;;  %281 = vmatprep.subr.mxu1 %v43_v1  ;;  %v724_v29 = vld [vmem:[%s971_s0] sm:$0xff]  ;;  %v163_v32 = vld [vmem:[%s970_s1 + $0x498] sm:$0xff]  ;;  %v105_v33 = vld [vmem:[%s970_s1 + $0x2c8] sm:$0xff] }
  0x21   :  { %219 = vmatpush1.msra.mxu0 %v16_v46  ;;  %282 = vmatpush1.msra.mxu1 %v42_v3  ;;  %v162_v34 = vld [vmem:[%s970_s1 + $0x490] sm:$0xff]  ;;  %v104_v35 = vld [vmem:[%s970_s1 + $0x2c0] sm:$0xff]  ;;  %v157_v36 = vld [vmem:[%s970_s1 + $0x468] sm:$0xff] }
  0x22   :  { %230 = vmatprep.subr.mxu0 %v173_v48  ;;  %283 = vmatprep.subr.mxu1 %v37_v5  ;;  %v99_v37 = vld [vmem:[%s970_s1 + $0x298] sm:$0xff]  ;;  %v156_v38 = vld [vmem:[%s970_s1 + $0x460] sm:$0xff]  ;;  %v98_v39 = vld [vmem:[%s970_s1 + $0x290] sm:$0xff] }
  0x23   :  { %231 = vmatpush2.msra.mxu0 %v172_v50  ;;  %284 = vmatpush1.msra.mxu1 %v36_v7  ;;  %v151_v40 = vld [vmem:[%s970_s1 + $0x438] sm:$0xff]  ;;  %v93_v41 = vld [vmem:[%s970_s1 + $0x268] sm:$0xff]  ;;  %v150_v42 = vld [vmem:[%s970_s1 + $0x430] sm:$0xff] }
  0x24   :  { %232 = vmatprep.subr.mxu0 %v167_v52  ;;  %285 = vmatprep.subr.mxu1 %v31_v9  ;;  %v92_v43 = vld [vmem:[%s970_s1 + $0x260] sm:$0xff]  ;;  %v145_v44 = vld [vmem:[%s970_s1 + $0x408] sm:$0xff]  ;;  %v87_v45 = vld [vmem:[%s970_s1 + $0x238] sm:$0xff] }
  0x25   :  { %233 = vmatpush2.msra.mxu0 %v166_v54  ;;  %286 = vmatpush1.msra.mxu1 %v30_v11  ;;  %v144_v46 = vld [vmem:[%s970_s1 + $0x400] sm:$0xff]  ;;  %v86_v47 = vld [vmem:[%s970_s1 + $0x230] sm:$0xff]  ;;  %v139_v48 = vld [vmem:[%s970_s1 + $0x3d8] sm:$0xff] }
  0x26   :  { %234 = vmatprep.subr.mxu0 %v161_v56  ;;  %287 = vmatprep.subr.mxu1 %v25_v13  ;;  %v81_v49 = vld [vmem:[%s970_s1 + $0x208] sm:$0xff]  ;;  %v138_v50 = vld [vmem:[%s970_s1 + $0x3d0] sm:$0xff]  ;;  %v80_v51 = vld [vmem:[%s970_s1 + $0x200] sm:$0xff] }
  0x27   :  { %235 = vmatpush2.msra.mxu0 %v160_v58  ;;  %288 = vmatpush1.msra.mxu1 %v24_v15  ;;  %v133_v52 = vld [vmem:[%s970_s1 + $0x3a8] sm:$0xff]  ;;  %v75_v53 = vld [vmem:[%s970_s1 + $0x1d8] sm:$0xff]  ;;  %v132_v54 = vld [vmem:[%s970_s1 + $0x3a0] sm:$0xff] }
  0x28   :  { %236 = vmatprep.subr.mxu0 %v155_v60  ;;  %289 = vmatprep.subr.mxu1 %v19_v17  ;;  %v74_v55 = vld [vmem:[%s970_s1 + $0x1d0] sm:$0xff]  ;;  %v127_v56 = vld [vmem:[%s970_s1 + $0x378] sm:$0xff]  ;;  %v69_v57 = vld [vmem:[%s970_s1 + $0x1a8] sm:$0xff] }
  0x29   :  { %237 = vmatpush2.msra.mxu0 %v154_v62  ;;  %290 = vmatpush1.msra.mxu1 %v18_v19  ;;  %v126_v58 = vld [vmem:[%s970_s1 + $0x370] sm:$0xff]  ;;  %v68_v59 = vld [vmem:[%s970_s1 + $0x1a0] sm:$0xff]  ;;  %v121_v60 = vld [vmem:[%s970_s1 + $0x348] sm:$0xff] }
  0x2a   :  { %238 = vmatprep.subr.mxu0 %v149_v0  ;;  %301 = vmatprep.subr.mxu1 %v175_v21  ;;  %v63_v61 = vld [vmem:[%s970_s1 + $0x178] sm:$0xff]  ;;  %v120_v62 = vld [vmem:[%s970_s1 + $0x340] sm:$0xff]  ;;  %v62_v63 = vld [vmem:[%s970_s1 + $0x170] sm:$0xff] }
  0x2b   :  { %239 = vmatpush2.msra.mxu0 %v148_v2  ;;  %302 = vmatpush2.msra.mxu1 %v174_v24  ;;  %v115_v0 = vld [vmem:[%s970_s1 + $0x318] sm:$0xff]  ;;  %v57_v1 = vld [vmem:[%s970_s1 + $0x148] sm:$0xff]  ;;  %v114_v2 = vld [vmem:[%s970_s1 + $0x310] sm:$0xff] }
  0x2c   :  { %240 = vmatprep.subr.mxu0 %v143_v4  ;;  %303 = vmatprep.subr.mxu1 %v169_v26  ;;  %v56_v3 = vld [vmem:[%s970_s1 + $0x140] sm:$0xff]  ;;  %v51_v4 = vld [vmem:[%s970_s1 + $0x118] sm:$0xff]  ;;  %v50_v5 = vld [vmem:[%s970_s1 + $0x110] sm:$0xff] }
  0x2d   :  { %241 = vmatpush2.msra.mxu0 %v142_v6  ;;  %304 = vmatpush2.msra.mxu1 %v168_v28  ;;  %v45_v6 = vld [vmem:[%s970_s1 + $0xe8] sm:$0xff]  ;;  %v178_v7 = vld [vmem:[%s972_s2] sm:$0xff]  ;;  %v39_v9 = vld [vmem:[%s970_s1 + $0xb8] sm:$0xff] }
  0x2e   :  { %242 = vmatprep.subr.mxu0 %v137_v8  ;;  %305 = vmatprep.subr.mxu1 %v163_v32  ;;  %v44_v8 = vld [vmem:[%s970_s1 + $0xe0] sm:$0xff]  ;;  %v33_v11 = vld [vmem:[%s970_s1 + $0x88] sm:$0xff]  ;;  %v26_v13 = vld [vmem:[%s970_s1 + $0x50] sm:$0xff] }
  0x2f   :  { %243 = vmatpush2.msra.mxu0 %v136_v10  ;;  %306 = vmatpush2.msra.mxu1 %v162_v34  ;;  %v38_v10 = vld [vmem:[%s970_s1 + $0xb0] sm:$0xff]  ;;  %v20_v15 = vld [vmem:[%s970_s1 + $0x20] sm:$0xff]  ;;  %v135_v32 = vld [vmem:[%s970_s1 + $0x3b8] sm:$0xff] }
  0x30   :  { %244 = vmatprep.subr.mxu0 %v131_v12  ;;  %307 = vmatprep.subr.mxu1 %v157_v36  ;;  %v32_v12 = vld [vmem:[%s970_s1 + $0x80] sm:$0xff]  ;;  %v170_v19 = vld [vmem:[%s970_s1 + $0x4d0] sm:$0xff]  ;;  %v129_v34 = vld [vmem:[%s970_s1 + $0x388] sm:$0xff] }
  0x31   :  { %245 = vmatpush2.msra.mxu0 %v130_v14  ;;  %308 = vmatpush2.msra.mxu1 %v156_v38  ;;  %v21_v14 = vld [vmem:[%s970_s1 + $0x28] sm:$0xff]  ;;  %v176_v17 = vld [vmem:[%s970_s1 + $0x500] sm:$0xff]  ;;  %v158_v24 = vld [vmem:[%s970_s1 + $0x470] sm:$0xff] }
  0x32   :  { %246 = vmatprep.subr.mxu0 %v125_v16  ;;  %309 = vmatprep.subr.mxu1 %v151_v40  ;;  %v177_v16 = vld [vmem:[%s970_s1 + $0x508] sm:$0xff]  ;;  %v164_v21 = vld [vmem:[%s970_s1 + $0x4a0] sm:$0xff]  ;;  %v146_v28 = vld [vmem:[%s970_s1 + $0x410] sm:$0xff] }
  0x33   :  { %247 = vmatpush2.msra.mxu0 %v124_v18  ;;  %310 = vmatpush2.msra.mxu1 %v150_v42  ;;  %v171_v18 = vld [vmem:[%s970_s1 + $0x4d8] sm:$0xff]  ;;  %v152_v26 = vld [vmem:[%s970_s1 + $0x440] sm:$0xff]  ;;  %v117_v38 = vld [vmem:[%s970_s1 + $0x328] sm:$0xff] }
  0x34   :  { %248 = vmatprep.subr.mxu0 %v119_v20  ;;  %311 = vmatprep.subr.mxu1 %v145_v44  ;;  %v165_v20 = vld [vmem:[%s970_s1 + $0x4a8] sm:$0xff]  ;;  %v123_v36 = vld [vmem:[%s970_s1 + $0x358] sm:$0xff] }
  0x35   :  { %249 = vmatpush2.msra.mxu0 %v118_v22  ;;  %312 = vmatpush2.msra.mxu1 %v144_v46  ;;  %v159_v22 = vld [vmem:[%s970_s1 + $0x478] sm:$0xff] }
  0x36   :  { %250 = vmatprep.subr.mxu0 %v113_v25  ;;  %313 = vmatprep.subr.mxu1 %v139_v48  ;;  %v153_v25 = vld [vmem:[%s970_s1 + $0x448] sm:$0xff] }
  0x37   :  { %251 = vmatpush2.msra.mxu0 %v112_v27  ;;  %314 = vmatpush2.msra.mxu1 %v138_v50  ;;  %v147_v27 = vld [vmem:[%s970_s1 + $0x418] sm:$0xff] }
  0x38   :  { %253 = vmatmul.mubr.f32.vlgmr.msra.gmra.mxu0 %v724_v29  ;;  %330 = vmatprep.subr.mxu0 %v111_v30  ;;  %v141_v30 = vld [vmem:[%s970_s1 + $0x3e8] sm:$0xff] }
  0x39   :  { %331 = vmatpush1.msra.mxu0 %v110_v31  ;;  %315 = vmatprep.subr.mxu1 %v133_v52  ;;  %v140_v31 = vld [vmem:[%s970_s1 + $0x3e0] sm:$0xff] }
  0x3a   :  { %332 = vmatprep.subr.mxu0 %v105_v33  ;;  %316 = vmatpush2.msra.mxu1 %v132_v54  ;;  %v134_v33 = vld [vmem:[%s970_s1 + $0x3b0] sm:$0xff] }
  0x3b   :  { %333 = vmatpush1.msra.mxu0 %v104_v35  ;;  %317 = vmatprep.subr.mxu1 %v127_v56  ;;  %v128_v35 = vld [vmem:[%s970_s1 + $0x380] sm:$0xff] }
  0x3c   :  { %334 = vmatprep.subr.mxu0 %v99_v37  ;;  %318 = vmatpush2.msra.mxu1 %v126_v58  ;;  %v122_v37 = vld [vmem:[%s970_s1 + $0x350] sm:$0xff] }
  0x3d   :  { %335 = vmatpush1.msra.mxu0 %v98_v39  ;;  %319 = vmatprep.subr.mxu1 %v121_v60  ;;  %v116_v39 = vld [vmem:[%s970_s1 + $0x320] sm:$0xff] }
  0x3e   :  { %336 = vmatprep.subr.mxu0 %v93_v41  ;;  %320 = vmatpush2.msra.mxu1 %v120_v62 }
  0x3f   :  { %337 = vmatpush1.msra.mxu0 %v92_v43  ;;  %321 = vmatprep.subr.mxu1 %v115_v0 }
  0x40   :  { %338 = vmatprep.subr.mxu0 %v87_v45  ;;  %322 = vmatpush2.msra.mxu1 %v114_v2 }
  0x41   :  { %339 = vmatpush1.msra.mxu0 %v86_v47  ;;  %419 = vmatprep.mubr.msk.f32.mxu1 %vm184_vm0, %v513_v23 }
  0x42   :  { %340 = vmatprep.subr.mxu0 %v81_v49  ;;  %324 = vmatmul.mubr.f32.vlgmr.msra.gmra.mxu1 %v724_v29 }
  0x43   :  { %341 = vmatpush1.msra.mxu0 %v80_v51  ;;  %420 = vmatprep.mubr.msk.f32.mxu0 %vm184_vm0, %v513_v23  ;;  %v27_v23 = vld [vmem:[%s970_s1 + $0x58] sm:$0xff] }
  0x44   :  { %342 = vmatprep.subr.mxu0 %v75_v53  ;;  %181 = vperm.xlu0 %422, %v178_v7  }
  0x45   :  { %343 = vmatpush1.msra.mxu0 %v74_v55 }
  0x46   :  { %344 = vmatprep.subr.mxu0 %v69_v57 }
  0x47   :  { %345 = vmatpush1.msra.mxu0 %v68_v59 }
  0x48   :  { %346 = vmatprep.subr.mxu0 %v63_v61 }
  0x49   :  { %347 = vmatpush1.msra.mxu0 %v62_v63 }
  0x4a   :  { %348 = vmatprep.subr.mxu0 %v57_v1 }
  0x4b   :  { %349 = vmatpush1.msra.mxu0 %v56_v3 }
  0x4c   :  { %350 = vmatprep.subr.mxu0 %v51_v4 }
  0x4d   :  { %351 = vmatpush1.msra.mxu0 %v50_v5 }
  0x4e   :  { %352 = vmatprep.subr.mxu0 %v45_v6 }
  0x4f   :  { %353 = vmatpush1.msra.mxu0 %v44_v8 }
  0x50   :  { %354 = vmatprep.subr.mxu0 %v39_v9 }
  0x51   :  { %355 = vmatpush1.msra.mxu0 %v38_v10 }
  0x52   :  { %356 = vmatprep.subr.mxu0 %v33_v11 }
  0x53   :  { %357 = vmatpush1.msra.mxu0 %v32_v12 }
  0x54   :  { %358 = vmatprep.subr.mxu0 %v27_v23 }
  0x55   :  { %359 = vmatpush1.msra.mxu0 %v26_v13 }
  0x56   :  { %360 = vmatprep.subr.mxu0 %v21_v14 }
  0x57   :  { %361 = vmatpush1.msra.mxu0 %v20_v15 }
  0x58   :  { %372 = vmatprep.subr.mxu0 %v177_v16 }
  0x59   :  { %373 = vmatpush2.msra.mxu0 %v176_v17 }
  0x5a   :  { %374 = vmatprep.subr.mxu0 %v171_v18 }
  0x5b   :  { %375 = vmatpush2.msra.mxu0 %v170_v19 }
  0x5c   :  { %376 = vmatprep.subr.mxu0 %v165_v20 }
  0x5d   :  { %377 = vmatpush2.msra.mxu0 %v164_v21 }
  0x5e   :  { %378 = vmatprep.subr.mxu0 %v159_v22 }
  0x5f   :  { %379 = vmatpush2.msra.mxu0 %v158_v24 }
  0x60   :  { %380 = vmatprep.subr.mxu0 %v153_v25 }
  0x61   :  { %381 = vmatpush2.msra.mxu0 %v152_v26 }
  0x62   :  { %382 = vmatprep.subr.mxu0 %v147_v27 }
  0x63   :  { %383 = vmatpush2.msra.mxu0 %v146_v28 }
  0x64   :  { %384 = vmatprep.subr.mxu0 %v141_v30 }
  0x65   :  { %385 = vmatpush2.msra.mxu0 %v140_v31 }
  0x66   :  { %386 = vmatprep.subr.mxu0 %v135_v32 }
  0x67   :  { %387 = vmatpush2.msra.mxu0 %v134_v33 }
  0x68   :  { %388 = vmatprep.subr.mxu0 %v129_v34 }
  0x69   :  { %389 = vmatpush2.msra.mxu0 %v128_v35 }
  0x6a   :  { %390 = vmatprep.subr.mxu0 %v123_v36 }
  0x6b   :  { %391 = vmatpush2.msra.mxu0 %v122_v37 }
  0x6c   :  { %392 = vmatprep.subr.mxu0 %v117_v38 }
  0x6d   :  { %393 = vmatpush2.msra.mxu0 %v116_v39 }
  0x6e   :  { %395 = vmatmul.mubr.f32.vlgmr.msra.gmra.mxu0 %v724_v29 }
  0xbf   :  { %v182_v40 = vpop.permute.xlu0 %181 }
  0xf8   :  { %v254_v41 = vpop.f32.mrf.mxu0 }
  0xf9   :  { %v255_v42 = vadd.f32 %v254_v41, %v182_v40 }
  0xfa   :  { %v256_v43 = vpop.f32.mrf.mxu0 }
  0xfb   :  { %v401_v44 = vmax.f32 %v255_v42, 0.0  ;;  %v257_v45 = vadd.f32 %v256_v43, %v182_v40 }
  0xfd   :  { %407 = vst [vmem:[%s973_s3] sm:$0xff] %v401_v44  ;;  %v402_v46 = vmax.f32 %v257_v45, 0.0 }
  0xff   :  { %408 = vst [vmem:[%s973_s3 + $0x8] sm:$0xff] %v402_v46 }
 0x102   :  { %v325_v47 = vpop.f32.mrf.mxu1 }
 0x103   :  { %v326_v48 = vadd.f32 %v325_v47, %v182_v40 }
 0x104   :  { %v327_v49 = vpop.f32.mrf.mxu1 }
 0x105   :  { %v403_v50 = vmax.f32 %v326_v48, 0.0  ;;  %v328_v29 = vadd.f32 %v327_v49, %v182_v40 }
 0x107   :  { %409 = vst [vmem:[%s973_s3 + $0x10] sm:$0xff] %v403_v50  ;;  %v404_v51 = vmax.f32 %v328_v29, 0.0 }
 0x109   :  { %410 = vst [vmem:[%s973_s3 + $0x18] sm:$0xff] %v404_v51 }
 0x12e   :  { %v396_v52 = vpop.f32.mrf.mxu0 }
 0x12f   :  { %v397_v53 = vadd.f32 %v396_v52, %v182_v40 }
 0x130   :  { %v398_v54 = vpop.f32.mrf.mxu0 }
 0x131   :  { %v405_v55 = vmax.f32 %v397_v53, 0.0  ;;  %v399_v56 = vadd.f32 %v398_v54, %v182_v40 }
 0x133   :  { %411 = vst [vmem:[%s973_s3 + $0x20] sm:$0xff] %v405_v55  ;;  %v406_v57 = vmax.f32 %v399_v56, 0.0 }
 0x135   :  { %413 = vst.msk [vmem:[%s973_s3 + $0x28] sm:$0xff] %vm412_vm1, %v406_v57 }

// kernel: forward.7
= control target key start
LH: loop header
LB: loop body
LE: loop exit
PB: predicated region body
PF: predicated region fallthrough
CT: control target
= control target key end

     0   :  { %v133_v0 = vmov 0.0   ;;  %v134_v3 = vmov 0   ;;  %vm49_vm0 = vcmask 719872   ;;  %s275_s1 = inlined_call_operand.vmem [shape: f32[216,128], index: 1, kind: input, shape index: {}]   ;;  %s276_s0 = inlined_call_operand.vmem [shape: f32[8,216], index: 0, kind: input, shape index: {}]   ;;  %s277_s2 = inlined_call_operand.vmem [shape: f32[8,1], index: 2, kind: input, shape index: {}]   ;;  %s278_s3 = inlined_call_operand.vmem [shape: f32[8,128], index: 3, kind: output, shape index: {}]  }
   0x1   :  { %53 = vmatprep.subr.mxu0 %v133_v0  ;;  %v31_v1 = vld [vmem:[%s275_s1 + $0x78] sm:$0xff]  ;;  %v30_v2 = vld [vmem:[%s275_s1 + $0x70] sm:$0xff]  ;;  %132 = vset.pattern.permute.xlu0 %v134_v3  ;;  %v29_v4 = vld [vmem:[%s275_s1 + $0x68] sm:$0xff] }
   0x2   :  { %54 = vmatpush1.msra.mxu0 %v31_v1  ;;  %v28_v5 = vld [vmem:[%s275_s1 + $0x60] sm:$0xff]  ;;  %v27_v6 = vld [vmem:[%s275_s1 + $0x58] sm:$0xff]  ;;  %v26_v7 = vld [vmem:[%s275_s1 + $0x50] sm:$0xff] }
   0x3   :  { %55 = vmatprep.subr.mxu0 %v133_v0  ;;  %v15_v8 = vld [vmem:[%s276_s0 + $0x8] sm:$0xff]  ;;  %v43_v9 = vld [vmem:[%s277_s2] sm:$0xff]  ;;  %v23_v12 = vld [vmem:[%s275_s1 + $0x38] sm:$0xff] }
   0x4   :  { %56 = vmatpush1.msra.mxu0 %v30_v2  ;;  %v25_v10 = vld [vmem:[%s275_s1 + $0x48] sm:$0xff]  ;;  %129 = vmatprep.mubr.msk.f32.mxu0 %vm49_vm0, %v15_v8  ;;  %v24_v11 = vld [vmem:[%s275_s1 + $0x40] sm:$0xff]  ;;  %v22_v13 = vld [vmem:[%s275_s1 + $0x30] sm:$0xff] }
   0x5   :  { %57 = vmatprep.subr.mxu0 %v133_v0  ;;  %46 = vperm.xlu0 %132, %v43_v9   ;;  %v21_v14 = vld [vmem:[%s275_s1 + $0x28] sm:$0xff]  ;;  %v20_v15 = vld [vmem:[%s275_s1 + $0x20] sm:$0xff]  ;;  %v19_v16 = vld [vmem:[%s275_s1 + $0x18] sm:$0xff] }
   0x6   :  { %58 = vmatpush1.msra.mxu0 %v29_v4  ;;  %v18_v17 = vld [vmem:[%s275_s1 + $0x10] sm:$0xff]  ;;  %v17_v18 = vld [vmem:[%s275_s1 + $0x8] sm:$0xff]  ;;  %v16_v19 = vld [vmem:[%s275_s1] sm:$0xff] }
   0x7   :  { %59 = vmatprep.subr.mxu0 %v133_v0  ;;  %v42_v20 = vld [vmem:[%s275_s1 + $0xd0] sm:$0xff]  ;;  %v41_v21 = vld [vmem:[%s275_s1 + $0xc8] sm:$0xff]  ;;  %v40_v22 = vld [vmem:[%s275_s1 + $0xc0] sm:$0xff] }
   0x8   :  { %60 = vmatpush1.msra.mxu0 %v28_v5  ;;  %v39_v23 = vld [vmem:[%s275_s1 + $0xb8] sm:$0xff]  ;;  %v38_v24 = vld [vmem:[%s275_s1 + $0xb0] sm:$0xff]  ;;  %v37_v25 = vld [vmem:[%s275_s1 + $0xa8] sm:$0xff] }
   0x9   :  { %61 = vmatprep.subr.mxu0 %v133_v0  ;;  %v36_v26 = vld [vmem:[%s275_s1 + $0xa0] sm:$0xff]  ;;  %v35_v27 = vld [vmem:[%s275_s1 + $0x98] sm:$0xff]  ;;  %v34_v28 = vld [vmem:[%s275_s1 + $0x90] sm:$0xff] }
   0xa   :  { %62 = vmatpush1.msra.mxu0 %v27_v6  ;;  %v33_v29 = vld [vmem:[%s275_s1 + $0x88] sm:$0xff]  ;;  %v32_v30 = vld [vmem:[%s275_s1 + $0x80] sm:$0xff] }
   0xb   :  { %63 = vmatprep.subr.mxu0 %v133_v0  ;;  %v14_v31 = vld [vmem:[%s276_s0] sm:$0xff] }
   0xc   :  { %64 = vmatpush1.msra.mxu0 %v26_v7 }
   0xd   :  { %65 = vmatprep.subr.mxu0 %v133_v0 }
   0xe   :  { %66 = vmatpush1.msra.mxu0 %v25_v10 }
   0xf   :  { %67 = vmatprep.subr.mxu0 %v133_v0 }
  0x10   :  { %68 = vmatpush1.msra.mxu0 %v24_v11 }
  0x11   :  { %69 = vmatprep.subr.mxu0 %v133_v0 }
  0x12   :  { %70 = vmatpush1.msra.mxu0 %v23_v12 }
  0x13   :  { %71 = vmatprep.subr.mxu0 %v133_v0 }
  0x14   :  { %72 = vmatpush1.msra.mxu0 %v22_v13 }
  0x15   :  { %73 = vmatprep.subr.mxu0 %v133_v0 }
  0x16   :  { %74 = vmatpush1.msra.mxu0 %v21_v14 }
  0x17   :  { %75 = vmatprep.subr.mxu0 %v133_v0 }
  0x18   :  { %76 = vmatpush1.msra.mxu0 %v20_v15 }
  0x19   :  { %77 = vmatprep.subr.mxu0 %v133_v0 }
  0x1a   :  { %78 = vmatpush1.msra.mxu0 %v19_v16 }
  0x1b   :  { %79 = vmatprep.subr.mxu0 %v133_v0 }
  0x1c   :  { %80 = vmatpush1.msra.mxu0 %v18_v17 }
  0x1d   :  { %81 = vmatprep.subr.mxu0 %v133_v0 }
  0x1e   :  { %82 = vmatpush1.msra.mxu0 %v17_v18 }
  0x1f   :  { %83 = vmatprep.subr.mxu0 %v133_v0 }
  0x20   :  { %84 = vmatpush1.msra.mxu0 %v16_v19 }
  0x21   :  { %95 = vmatprep.subr.mxu0 %v133_v0 }
  0x22   :  { %96 = vmatpush2.msra.mxu0 %v42_v20 }
  0x23   :  { %97 = vmatprep.subr.mxu0 %v133_v0 }
  0x24   :  { %98 = vmatpush2.msra.mxu0 %v41_v21 }
  0x25   :  { %99 = vmatprep.subr.mxu0 %v133_v0 }
  0x26   :  { %100 = vmatpush2.msra.mxu0 %v40_v22 }
  0x27   :  { %101 = vmatprep.subr.mxu0 %v133_v0 }
  0x28   :  { %102 = vmatpush2.msra.mxu0 %v39_v23 }
  0x29   :  { %103 = vmatprep.subr.mxu0 %v133_v0 }
  0x2a   :  { %104 = vmatpush2.msra.mxu0 %v38_v24 }
  0x2b   :  { %105 = vmatprep.subr.mxu0 %v133_v0 }
  0x2c   :  { %106 = vmatpush2.msra.mxu0 %v37_v25 }
  0x2d   :  { %107 = vmatprep.subr.mxu0 %v133_v0 }
  0x2e   :  { %108 = vmatpush2.msra.mxu0 %v36_v26 }
  0x2f   :  { %109 = vmatprep.subr.mxu0 %v133_v0 }
  0x30   :  { %110 = vmatpush2.msra.mxu0 %v35_v27 }
  0x31   :  { %111 = vmatprep.subr.mxu0 %v133_v0 }
  0x32   :  { %112 = vmatpush2.msra.mxu0 %v34_v28 }
  0x33   :  { %113 = vmatprep.subr.mxu0 %v133_v0 }
  0x34   :  { %114 = vmatpush2.msra.mxu0 %v33_v29 }
  0x35   :  { %115 = vmatprep.subr.mxu0 %v133_v0 }
  0x36   :  { %116 = vmatpush2.msra.mxu0 %v32_v30 }
  0x37   :  { %118 = vmatmul.mubr.f32.vlgmr.msra.gmra.mxu0 %v14_v31 }
  0x80   :  { %v47_v32 = vpop.permute.xlu0 %46 }
  0xf7   :  { %v119_v33 = vpop.f32.mrf.mxu0 }
  0xf8   :  { %v120_v34 = vadd.f32 %v119_v33, %v47_v32 }
  0xf9   :  { %v121_v35 = vpop.f32.mrf.mxu0 }
  0xfa   :  { %v123_v36 = vmax.f32 %v120_v34, 0.0 }
  0xfc   :  { %124 = vst [vmem:[%s278_s3] sm:$0xff] %v123_v36 }

// kernel: forward.8
= control target key start
LH: loop header
LB: loop body
LE: loop exit
PB: predicated region body
PF: predicated region fallthrough
CT: control target
= control target key end

     0   :  { %v134_v0 = vmov 0.0   ;;  %v135_v3 = vmov 0   ;;  %vm49_vm0 = vcmask 719872   ;;  %vm124_vm1 = vcmask 130048   ;;  %s276_s1 = inlined_call_operand.vmem [shape: f32[216,16], index: 1, kind: input, shape index: {}]   ;;  %s277_s0 = inlined_call_operand.vmem [shape: f32[8,216], index: 0, kind: input, shape index: {}]   ;;  %s278_s2 = inlined_call_operand.vmem [shape: f32[8,1], index: 2, kind: input, shape index: {}]   ;;  %s279_s3 = inlined_call_operand.vmem [shape: f32[8,16], index: 3, kind: output, shape index: {}]  }
   0x1   :  { %53 = vmatprep.subr.mxu0 %v134_v0  ;;  %v31_v1 = vld [vmem:[%s276_s1 + $0x78] sm:$0xff]  ;;  %v30_v2 = vld [vmem:[%s276_s1 + $0x70] sm:$0xff]  ;;  %133 = vset.pattern.permute.xlu0 %v135_v3  ;;  %v29_v4 = vld [vmem:[%s276_s1 + $0x68] sm:$0xff] }
   0x2   :  { %54 = vmatpush1.msra.mxu0 %v31_v1  ;;  %v28_v5 = vld [vmem:[%s276_s1 + $0x60] sm:$0xff]  ;;  %v27_v6 = vld [vmem:[%s276_s1 + $0x58] sm:$0xff]  ;;  %v26_v7 = vld [vmem:[%s276_s1 + $0x50] sm:$0xff] }
   0x3   :  { %55 = vmatprep.subr.mxu0 %v134_v0  ;;  %v15_v8 = vld [vmem:[%s277_s0 + $0x8] sm:$0xff]  ;;  %v43_v9 = vld [vmem:[%s278_s2] sm:$0xff]  ;;  %v23_v12 = vld [vmem:[%s276_s1 + $0x38] sm:$0xff] }
   0x4   :  { %56 = vmatpush1.msra.mxu0 %v30_v2  ;;  %v25_v10 = vld [vmem:[%s276_s1 + $0x48] sm:$0xff]  ;;  %130 = vmatprep.mubr.msk.f32.mxu0 %vm49_vm0, %v15_v8  ;;  %v24_v11 = vld [vmem:[%s276_s1 + $0x40] sm:$0xff]  ;;  %v22_v13 = vld [vmem:[%s276_s1 + $0x30] sm:$0xff] }
   0x5   :  { %57 = vmatprep.subr.mxu0 %v134_v0  ;;  %46 = vperm.xlu0 %133, %v43_v9   ;;  %v21_v14 = vld [vmem:[%s276_s1 + $0x28] sm:$0xff]  ;;  %v20_v15 = vld [vmem:[%s276_s1 + $0x20] sm:$0xff]  ;;  %v19_v16 = vld [vmem:[%s276_s1 + $0x18] sm:$0xff] }
   0x6   :  { %58 = vmatpush1.msra.mxu0 %v29_v4  ;;  %v18_v17 = vld [vmem:[%s276_s1 + $0x10] sm:$0xff]  ;;  %v17_v18 = vld [vmem:[%s276_s1 + $0x8] sm:$0xff]  ;;  %v16_v19 = vld [vmem:[%s276_s1] sm:$0xff] }
   0x7   :  { %59 = vmatprep.subr.mxu0 %v134_v0  ;;  %v42_v20 = vld [vmem:[%s276_s1 + $0xd0] sm:$0xff]  ;;  %v41_v21 = vld [vmem:[%s276_s1 + $0xc8] sm:$0xff]  ;;  %v40_v22 = vld [vmem:[%s276_s1 + $0xc0] sm:$0xff] }
   0x8   :  { %60 = vmatpush1.msra.mxu0 %v28_v5  ;;  %v39_v23 = vld [vmem:[%s276_s1 + $0xb8] sm:$0xff]  ;;  %v38_v24 = vld [vmem:[%s276_s1 + $0xb0] sm:$0xff]  ;;  %v37_v25 = vld [vmem:[%s276_s1 + $0xa8] sm:$0xff] }
   0x9   :  { %61 = vmatprep.subr.mxu0 %v134_v0  ;;  %v36_v26 = vld [vmem:[%s276_s1 + $0xa0] sm:$0xff]  ;;  %v35_v27 = vld [vmem:[%s276_s1 + $0x98] sm:$0xff]  ;;  %v34_v28 = vld [vmem:[%s276_s1 + $0x90] sm:$0xff] }
   0xa   :  { %62 = vmatpush1.msra.mxu0 %v27_v6  ;;  %v33_v29 = vld [vmem:[%s276_s1 + $0x88] sm:$0xff]  ;;  %v32_v30 = vld [vmem:[%s276_s1 + $0x80] sm:$0xff] }
   0xb   :  { %63 = vmatprep.subr.mxu0 %v134_v0  ;;  %v14_v31 = vld [vmem:[%s277_s0] sm:$0xff] }
   0xc   :  { %64 = vmatpush1.msra.mxu0 %v26_v7 }
   0xd   :  { %65 = vmatprep.subr.mxu0 %v134_v0 }
   0xe   :  { %66 = vmatpush1.msra.mxu0 %v25_v10 }
   0xf   :  { %67 = vmatprep.subr.mxu0 %v134_v0 }
  0x10   :  { %68 = vmatpush1.msra.mxu0 %v24_v11 }
  0x11   :  { %69 = vmatprep.subr.mxu0 %v134_v0 }
  0x12   :  { %70 = vmatpush1.msra.mxu0 %v23_v12 }
  0x13   :  { %71 = vmatprep.subr.mxu0 %v134_v0 }
  0x14   :  { %72 = vmatpush1.msra.mxu0 %v22_v13 }
  0x15   :  { %73 = vmatprep.subr.mxu0 %v134_v0 }
  0x16   :  { %74 = vmatpush1.msra.mxu0 %v21_v14 }
  0x17   :  { %75 = vmatprep.subr.mxu0 %v134_v0 }
  0x18   :  { %76 = vmatpush1.msra.mxu0 %v20_v15 }
  0x19   :  { %77 = vmatprep.subr.mxu0 %v134_v0 }
  0x1a   :  { %78 = vmatpush1.msra.mxu0 %v19_v16 }
  0x1b   :  { %79 = vmatprep.subr.mxu0 %v134_v0 }
  0x1c   :  { %80 = vmatpush1.msra.mxu0 %v18_v17 }
  0x1d   :  { %81 = vmatprep.subr.mxu0 %v134_v0 }
  0x1e   :  { %82 = vmatpush1.msra.mxu0 %v17_v18 }
  0x1f   :  { %83 = vmatprep.subr.mxu0 %v134_v0 }
  0x20   :  { %84 = vmatpush1.msra.mxu0 %v16_v19 }
  0x21   :  { %95 = vmatprep.subr.mxu0 %v134_v0 }
  0x22   :  { %96 = vmatpush2.msra.mxu0 %v42_v20 }
  0x23   :  { %97 = vmatprep.subr.mxu0 %v134_v0 }
  0x24   :  { %98 = vmatpush2.msra.mxu0 %v41_v21 }
  0x25   :  { %99 = vmatprep.subr.mxu0 %v134_v0 }
  0x26   :  { %100 = vmatpush2.msra.mxu0 %v40_v22 }
  0x27   :  { %101 = vmatprep.subr.mxu0 %v134_v0 }
  0x28   :  { %102 = vmatpush2.msra.mxu0 %v39_v23 }
  0x29   :  { %103 = vmatprep.subr.mxu0 %v134_v0 }
  0x2a   :  { %104 = vmatpush2.msra.mxu0 %v38_v24 }
  0x2b   :  { %105 = vmatprep.subr.mxu0 %v134_v0 }
  0x2c   :  { %106 = vmatpush2.msra.mxu0 %v37_v25 }
  0x2d   :  { %107 = vmatprep.subr.mxu0 %v134_v0 }
  0x2e   :  { %108 = vmatpush2.msra.mxu0 %v36_v26 }
  0x2f   :  { %109 = vmatprep.subr.mxu0 %v134_v0 }
  0x30   :  { %110 = vmatpush2.msra.mxu0 %v35_v27 }
  0x31   :  { %111 = vmatprep.subr.mxu0 %v134_v0 }
  0x32   :  { %112 = vmatpush2.msra.mxu0 %v34_v28 }
  0x33   :  { %113 = vmatprep.subr.mxu0 %v134_v0 }
  0x34   :  { %114 = vmatpush2.msra.mxu0 %v33_v29 }
  0x35   :  { %115 = vmatprep.subr.mxu0 %v134_v0 }
  0x36   :  { %116 = vmatpush2.msra.mxu0 %v32_v30 }
  0x37   :  { %118 = vmatmul.mubr.f32.vlgmr.msra.gmra.mxu0 %v14_v31 }
  0x80   :  { %v47_v32 = vpop.permute.xlu0 %46 }
  0xf7   :  { %v119_v33 = vpop.f32.mrf.mxu0 }
  0xf8   :  { %v120_v34 = vadd.f32 %v119_v33, %v47_v32 }
  0xf9   :  { %v121_v35 = vpop.f32.mrf.mxu0 }
  0xfa   :  { %v123_v36 = vmax.f32 %v120_v34, 0.0 }
  0xfc   :  { %125 = vst.msk [vmem:[%s279_s3] sm:$0xff] %vm124_vm1, %v123_v36 }

// kernel: forward.9
= control target key start
LH: loop header
LB: loop body
LE: loop exit
PB: predicated region body
PF: predicated region fallthrough
CT: control target
= control target key end

     0   :  { %v321_v0 = vmov 0.0   ;;  %v322_v3 = vmov 0   ;;  %vm58_vm0 = vcmask 719872   ;;  %vm138_vm1 = vcmask 1041408   ;;  %s492_s1 = inlined_call_operand.vmem [shape: f32[216,2], index: 1, kind: input, shape index: {}]   ;;  %s493_s0 = inlined_call_operand.vmem [shape: f32[8,216], index: 0, kind: input, shape index: {}]   ;;  %s494_s2 = inlined_call_operand.vmem [shape: f32[8,1], index: 2, kind: input, shape index: {}]   ;;  %s495_s5 = inlined_call_operand.vmem [shape: f32[3,1], index: 5, kind: input, shape index: {}]   ;;  %s496_s3 = inlined_call_operand.vmem [shape: f32[2,2], index: 3, kind: input, shape index: {}]   ;;  %s497_s4 = inlined_call_operand.vmem [shape: f32[3,8], index: 4, kind: input, shape index: {}]   ;;  %s498_s6 = inlined_call_operand.vmem [shape: f32[3,2], index: 6, kind: output, shape index: {}]  }
   0x1   :  { %62 = vmatprep.subr.mxu0 %v321_v0  ;;  %v40_v1 = vld [vmem:[%s492_s1 + $0x78] sm:$0xff]  ;;  %v39_v2 = vld [vmem:[%s492_s1 + $0x70] sm:$0xff]  ;;  %320 = vset.pattern.permute.xlu0 %v322_v3  ;;  %v38_v4 = vld [vmem:[%s492_s1 + $0x68] sm:$0xff]  ;;  %vm323_vm2 = vmmov 0   ;;  %vm134_vm3 = vcmask 15360   ;;  %vm219_vm4 = vcmask 64512  }
   0x2   :  { %63 = vmatpush1.msra.mxu0 %v40_v1  ;;  %307 = vmatprep.subr.mxu1 %v321_v0  ;;  %v37_v5 = vld [vmem:[%s492_s1 + $0x60] sm:$0xff]  ;;  %v36_v6 = vld [vmem:[%s492_s1 + $0x58] sm:$0xff]  ;;  %v35_v7 = vld [vmem:[%s492_s1 + $0x50] sm:$0xff]  ;;  %vm293_vm5 = vcmask 10240  }
   0x3   :  { %64 = vmatprep.subr.mxu0 %v321_v0  ;;  %v24_v8 = vld [vmem:[%s493_s0 + $0x8] sm:$0xff]  ;;  %v52_v9 = vld [vmem:[%s494_s2] sm:$0xff]  ;;  %v32_v13 = vld [vmem:[%s492_s1 + $0x38] sm:$0xff]  ;;  %309 = vmatprep.mubr.msk.f32.mxu1 %vm323_vm2, %v321_v0 }
   0x4   :  { %65 = vmatpush1.msra.mxu0 %v39_v2  ;;  %v34_v10 = vld [vmem:[%s492_s1 + $0x48] sm:$0xff]  ;;  %299 = vmatprep.mubr.msk.f32.mxu0 %vm58_vm0, %v24_v8  ;;  %v33_v11 = vld [vmem:[%s492_s1 + $0x40] sm:$0xff]  ;;  %v31_v14 = vld [vmem:[%s492_s1 + $0x30] sm:$0xff] }
   0x5   :  { %66 = vmatprep.subr.mxu0 %v321_v0  ;;  %55 = vperm.xlu0 %320, %v52_v9   ;;  %v213_v12 = vld [vmem:[%s495_s5] sm:$0x7]  ;;  %v30_v15 = vld [vmem:[%s492_s1 + $0x28] sm:$0xff]  ;;  %v28_v17 = vld [vmem:[%s492_s1 + $0x18] sm:$0xff] }
   0x6   :  { %67 = vmatpush1.msra.mxu0 %v38_v4  ;;  %v29_v16 = vld [vmem:[%s492_s1 + $0x20] sm:$0xff]  ;;  %v27_v18 = vld [vmem:[%s492_s1 + $0x10] sm:$0xff]  ;;  %v26_v19 = vld [vmem:[%s492_s1 + $0x8] sm:$0xff] }
   0x7   :  { %68 = vmatprep.subr.mxu0 %v321_v0  ;;  %v25_v20 = vld [vmem:[%s492_s1] sm:$0xff]  ;;  %v51_v21 = vld [vmem:[%s492_s1 + $0xd0] sm:$0xff]  ;;  %v50_v22 = vld [vmem:[%s492_s1 + $0xc8] sm:$0xff] }
   0x8   :  { %69 = vmatpush1.msra.mxu0 %v37_v5  ;;  %v49_v23 = vld [vmem:[%s492_s1 + $0xc0] sm:$0xff]  ;;  %v48_v24 = vld [vmem:[%s492_s1 + $0xb8] sm:$0xff]  ;;  %v47_v25 = vld [vmem:[%s492_s1 + $0xb0] sm:$0xff] }
   0x9   :  { %70 = vmatprep.subr.mxu0 %v321_v0  ;;  %216 = vperm.xlu0 %320, %v213_v12   ;;  %v46_v26 = vld [vmem:[%s492_s1 + $0xa8] sm:$0xff]  ;;  %v45_v27 = vld [vmem:[%s492_s1 + $0xa0] sm:$0xff]  ;;  %v44_v28 = vld [vmem:[%s492_s1 + $0x98] sm:$0xff] }
   0xa   :  { %71 = vmatpush1.msra.mxu0 %v36_v6  ;;  %v43_v29 = vld [vmem:[%s492_s1 + $0x90] sm:$0xff]  ;;  %v42_v30 = vld [vmem:[%s492_s1 + $0x88] sm:$0xff]  ;;  %v41_v31 = vld [vmem:[%s492_s1 + $0x80] sm:$0xff] }
   0xb   :  { %72 = vmatprep.subr.mxu0 %v321_v0  ;;  %v23_v32 = vld [vmem:[%s493_s0] sm:$0xff] }
   0xc   :  { %73 = vmatpush1.msra.mxu0 %v35_v7  ;;  %v133_v33 = vld [vmem:[%s496_s3] sm:$0x3] }
   0xd   :  { %74 = vmatprep.subr.mxu0 %v321_v0  ;;  %308 = vmatpush3.msk.msra.mxu1 %vm138_vm1, %v133_v33  ;;  %v212_v39 = vld [vmem:[%s497_s4] sm:$0x7] }
   0xe   :  { %75 = vmatpush1.msra.mxu0 %v34_v10  ;;  %312 = vmatprep.subr.mxu1 %v321_v0 }
   0xf   :  { %76 = vmatprep.subr.mxu0 %v321_v0 }
  0x10   :  { %77 = vmatpush1.msra.mxu0 %v33_v11 }
  0x11   :  { %78 = vmatprep.subr.mxu0 %v321_v0 }
  0x12   :  { %79 = vmatpush1.msra.mxu0 %v32_v13 }
  0x13   :  { %80 = vmatprep.subr.mxu0 %v321_v0 }
  0x14   :  { %81 = vmatpush1.msra.mxu0 %v31_v14 }
  0x15   :  { %82 = vmatprep.subr.mxu0 %v321_v0 }
  0x16   :  { %83 = vmatpush1.msra.mxu0 %v30_v15 }
  0x17   :  { %84 = vmatprep.subr.mxu0 %v321_v0 }
  0x18   :  { %85 = vmatpush1.msra.mxu0 %v29_v16 }
  0x19   :  { %86 = vmatprep.subr.mxu0 %v321_v0 }
  0x1a   :  { %87 = vmatpush1.msra.mxu0 %v28_v17 }
  0x1b   :  { %88 = vmatprep.subr.mxu0 %v321_v0 }
  0x1c   :  { %89 = vmatpush1.msra.mxu0 %v27_v18 }
  0x1d   :  { %90 = vmatprep.subr.mxu0 %v321_v0 }
  0x1e   :  { %91 = vmatpush1.msra.mxu0 %v26_v19 }
  0x1f   :  { %92 = vmatprep.subr.mxu0 %v321_v0 }
  0x20   :  { %93 = vmatpush1.msra.mxu0 %v25_v20 }
  0x21   :  { %104 = vmatprep.subr.mxu0 %v321_v0 }
  0x22   :  { %105 = vmatpush2.msra.mxu0 %v51_v21 }
  0x23   :  { %106 = vmatprep.subr.mxu0 %v321_v0 }
  0x24   :  { %107 = vmatpush2.msra.mxu0 %v50_v22 }
  0x25   :  { %108 = vmatprep.subr.mxu0 %v321_v0 }
  0x26   :  { %109 = vmatpush2.msra.mxu0 %v49_v23 }
  0x27   :  { %110 = vmatprep.subr.mxu0 %v321_v0 }
  0x28   :  { %111 = vmatpush2.msra.mxu0 %v48_v24 }
  0x29   :  { %112 = vmatprep.subr.mxu0 %v321_v0 }
  0x2a   :  { %113 = vmatpush2.msra.mxu0 %v47_v25 }
  0x2b   :  { %114 = vmatprep.subr.mxu0 %v321_v0 }
  0x2c   :  { %115 = vmatpush2.msra.mxu0 %v46_v26 }
  0x2d   :  { %116 = vmatprep.subr.mxu0 %v321_v0 }
  0x2e   :  { %117 = vmatpush2.msra.mxu0 %v45_v27 }
  0x2f   :  { %118 = vmatprep.subr.mxu0 %v321_v0 }
  0x30   :  { %119 = vmatpush2.msra.mxu0 %v44_v28 }
  0x31   :  { %120 = vmatprep.subr.mxu0 %v321_v0 }
  0x32   :  { %121 = vmatpush2.msra.mxu0 %v43_v29 }
  0x33   :  { %122 = vmatprep.subr.mxu0 %v321_v0 }
  0x34   :  { %123 = vmatpush2.msra.mxu0 %v42_v30 }
  0x35   :  { %124 = vmatprep.subr.mxu0 %v321_v0 }
  0x36   :  { %125 = vmatpush2.msra.mxu0 %v41_v31 }
  0x37   :  { %127 = vmatmul.mubr.f32.vlgmr.msra.gmra.mxu0 %v23_v32 }
  0x80   :  { %v56_v34 = vpop.permute.xlu0 %55 }
  0x84   :  { %v217_v42 = vpop.permute.xlu0 %216 }
  0xf7   :  { %v128_v35 = vpop.f32.mrf.mxu0 }
  0xf8   :  { %v129_v36 = vadd.f32 %v128_v35, %v56_v34 }
  0xf9   :  { %v130_v37 = vpop.f32.mrf.mxu0 }
  0xfa   :  { %v132_v38 = vmax.f32 %v129_v36, 0.0 }
  0xfc   :  { %310 = vmatmul.mubr.msk.f32.vlgmr.msra.gmra.mxu1 %vm134_vm3, %v132_v38 }
  0xfd   :  { %314 = vmatprep.mubr.msk.f32.mxu1 %vm323_vm2, %v321_v0 }
 0x1bc   :  { %v208_v40 = vpop.f32.mrf.mxu1 }
 0x1bd   :  { %313 = vmatpush3.msra.mxu1 %v208_v40 }
 0x1be   :  { %v311_v41 = vpop.f32.mrf.mxu1  ;;  %315 = vmatmul.mubr.msk.f32.vlgmr.msra.gmra.mxu1 %vm219_vm4, %v212_v39 }
 0x27e   :  { %v289_v43 = vpop.f32.mrf.mxu1 }
 0x27f   :  { %v290_v44 = vadd.f32 %v289_v43, %v217_v42 }
 0x280   :  { %v316_v45 = vpop.f32.mrf.mxu1 }
 0x281   :  { %294 = vst.msk [vmem:[%s498_s6] sm:$0x7] %vm293_vm5, %v290_v44 }

</bundles_post_ra>
